<compile_context>
chip_gen: v7x
topology: tpu7x:2x2x1
jax: 0.10.0
libtpu: 0.0.40
codegen_flags: <defaults>
</compile_context>

<pallas_src>
import functools

import jax
import jax.numpy as jnp
from jax.experimental import pallas as pl
from jax.experimental.pallas import tpu as pltpu


# --------------------------------------------------------------------------
# Hardware helpers
# --------------------------------------------------------------------------
def _vmem_limit_bytes():
    """Explicit VMEM budget: ~7/8 of physical VMEM.  Fallback 56 MiB is safe on
    every generation (v7x: 64 MiB physical per TensorCore) and is already far
    above the 16/32 MiB scoped-VMEM defaults."""
    try:
        cap = getattr(pltpu.get_tpu_info(), "vmem_capacity_bytes", None)
        if cap:
            return int(cap) * 7 // 8
    except Exception:
        pass
    return 56 * 1024 * 1024


# --------------------------------------------------------------------------
# Shared in-kernel helpers (transposed layout: arrays are (dim, nodes))
# --------------------------------------------------------------------------
def _elu(x):
    # torch.nn.ELU(alpha=1).  exp argument is clamped so the unselected branch
    # never produces inf; exp(x)-1 (vs expm1) drifts < 1e-7 absolute vs torch.
    return jnp.where(x > 0, x, jnp.exp(jnp.minimum(x, 0.0)) - 1.0)


def _gate_weight(lin_t, non_t, w1a, w1b, b1, w2d, nd, inv_gum, inv_div, b2d,
                 hard):
    """Gating_Net MLP + gumbel gate, reduced to the class-0 (linear) weight.

    Transposed layout: lin_t/non_t are (D, n_tile).  Gating_Net =
    Linear(2D,H) -> BatchNorm1d(eval, fresh stats)=id -> Dropout(eval)=id ->
    ReLU -> Linear(H,2).  [lin|non] @ W1 is evaluated as W1a @ lin^T +
    W1b @ non^T (identical math, no lane concatenation), and the 2-class
    gumbel softmax is algebraically a sigmoid of the perturbed logit diff:
        w_lin = sigmoid(((z0 - z1) + (n0 - n1)/div_noise) / gum_temp)
    hard=True -> one-hot at argmax == (diff >= 0); ties pick class 0 (torch).
    Matmul operands are bf16 (MXU), accumulation is f32.
    """
    h = (jnp.dot(w1a, lin_t.astype(jnp.bfloat16),
                 preferred_element_type=jnp.float32)
         + jnp.dot(w1b, non_t.astype(jnp.bfloat16),
                   preferred_element_type=jnp.float32)
         + b1)                                            # (H, n_tile)
    h = jnp.maximum(h, 0.0)
    h = h.astype(jnp.bfloat16).astype(jnp.float32)        # match ref rounding
    ld = jnp.sum(h * w2d, axis=0, keepdims=True)          # z0 - z1, (1, n_tile)
    s = (ld + b2d + nd * inv_div) * inv_gum
    if hard:
        return (s >= 0.0).astype(jnp.float32)
    return 1.0 / (1.0 + jnp.exp(-s))


def _prep_gate(w1, b1, w2, b2, noise, d):
    """Host-side reshuffle of one Gating_Net's params for the transposed
    sigmoid-difference formulation."""
    h = w1.shape[1]
    w1a = w1[:d].T.astype(jnp.bfloat16)            # (H, D): multiplies lin^T
    w1b = w1[d:].T.astype(jnp.bfloat16)            # (H, D): multiplies non^T
    b1c = b1.reshape(h, 1).astype(jnp.float32)
    w2r = w2.astype(jnp.bfloat16).astype(jnp.float32)
    w2d = (w2r[:, 0] - w2r[:, 1]).reshape(h, 1)    # logit-difference weights
    b2d = (b2[0] - b2[1]).astype(jnp.float32)
    nd = (noise[:, 0] - noise[:, 1]).reshape(1, -1).astype(jnp.float32)
    return w1a, w1b, b1c, w2d, b2d, nd


# --------------------------------------------------------------------------
# Path 1: whole forward fused into a single pallas_call (small graphs)
# --------------------------------------------------------------------------
def _fused_kernel(hard, scal_ref, g_ref, e0_ref,
                  w1a1_ref, w1b1_ref, b11_ref, w2d1_ref, nd1_ref,
                  w1a2_ref, w1b2_ref, b12_ref, w2d2_ref, nd2_ref,
                  light_ref):
    inv_gum, inv_div = scal_ref[0], scal_ref[1]
    b2d1, b2d2 = scal_ref[2], scal_ref[3]
    g = g_ref[...]                                  # (N, N) bf16, VMEM-resident
    e0 = e0_ref[...]                                # (D, N) f32

    def prop(e_t):                                  # (G @ E)^T == E^T @ G
        return jnp.dot(e_t.astype(jnp.bfloat16), g,
                       preferred_element_type=jnp.float32)

    # 5-way layer mean accumulated incrementally -> fewer live (D,N) temps.
    acc = e0
    lin1 = prop(e0)
    acc = acc + lin1
    lin2 = prop(lin1)
    acc = acc + lin2
    non1 = _elu(lin1)                               # ELU(G @ e0) == ELU(lin1)
    lin3 = prop(lin2)
    wl = _gate_weight(lin3, non1, w1a1_ref[...], w1b1_ref[...], b11_ref[...],
                      w2d1_ref[...], nd1_ref[...], inv_gum, inv_div, b2d1,
                      hard)
    emb1 = wl * lin3 + (1.0 - wl) * non1            # __choosing_one
    acc = acc + emb1
    lin4 = prop(emb1)
    non2 = _elu(lin4)
    wl = _gate_weight(lin4, non2, w1a2_ref[...], w1b2_ref[...], b12_ref[...],
                      w2d2_ref[...], nd2_ref[...], inv_gum, inv_div, b2d2,
                      hard)
    emb2 = wl * lin4 + (1.0 - wl) * non2
    light_ref[...] = (acc + emb2) * jnp.float32(0.2)   # mean of 5 layers


def hmlet_forward_fused(params, g, users, items, gum_temp, div_noise, hard):
    """Single-kernel forward: no grid, so every input is a single-buffered
    whole-array VMEM resident.  Use while n*n*2B (bf16 graph) + ~8*n*D*4B fits
    the VMEM budget; otherwise use hmlet_forward_tiled."""
    num_users = params["num_users"]
    e0 = jnp.concatenate([params["user_emb"], params["item_emb"]], axis=0)
    n, d = e0.shape

    g1 = _prep_gate(params["g1_w1"], params["g1_b1"], params["g1_w2"],
                    params["g1_b2"], params["noise1"], d)
    g2 = _prep_gate(params["g2_w1"], params["g2_b1"], params["g2_w2"],
                    params["g2_b2"], params["noise2"], d)
    scal = jnp.stack([jnp.float32(1.0 / gum_temp),
                      jnp.float32(1.0 / div_noise), g1[4], g2[4]])

    vspec = lambda: pl.BlockSpec(memory_space=pltpu.MemorySpace.VMEM)
    sspec = pl.BlockSpec(memory_space=pltpu.MemorySpace.SMEM)
    kern = functools.partial(_fused_kernel, bool(hard))
    light_t = pl.pallas_call(
        kern,
        out_shape=jax.ShapeDtypeStruct((d, n), jnp.float32),
        in_specs=[sspec] + [vspec() for _ in range(12)],
        out_specs=vspec(),
        compiler_params=pltpu.CompilerParams(
            vmem_limit_bytes=_vmem_limit_bytes()),
    )(scal, g.astype(jnp.bfloat16), e0.T.astype(jnp.float32),
      g1[0], g1[1], g1[2], g1[3], g1[5],
      g2[0], g2[1], g2[2], g2[3], g2[5])

    # Tiny gather + row-dot: plain JAX (a Pallas kernel here is pure launch
    # overhead).
    users_t = light_t[:, users]
    items_t = light_t[:, num_users + items]
    return jnp.sum(users_t * items_t, axis=0)


# --------------------------------------------------------------------------
# Path 2: VMEM-safe tiled kernels (large graphs)
# --------------------------------------------------------------------------
def _prop_kernel(e_ref, g_ref, o_ref):
    # out^T = E^T @ G, accumulated directly into the resident f32 output block.
    @pl.when(pl.program_id(1) == 0)
    def _():
        o_ref[...] = jnp.zeros_like(o_ref)

    o_ref[...] += jnp.dot(e_ref[...], g_ref[...],
                          preferred_element_type=jnp.float32)


def _prop_kernel_dual(e_ref, g_ref, o_ref, o16_ref):
    @pl.when(pl.program_id(1) == 0)
    def _():
        o_ref[...] = jnp.zeros_like(o_ref)

    o_ref[...] += jnp.dot(e_ref[...], g_ref[...],
                          preferred_element_type=jnp.float32)

    @pl.when(pl.program_id(1) == pl.num_programs(1) - 1)
    def _():
        # bf16 copy for the NEXT propagation -> no separate HBM cast pass.
        o16_ref[...] = o_ref[...].astype(jnp.bfloat16)


def propagate(g16, e16, *, tn, tk, emit_bf16):
    """out^T = E^T @ G with output-column ('parallel') and K ('arbitrary')
    tiling.  G is symmetric, so this equals (G @ E)^T.  Transposed layout keeps
    the node axis on the 128-lane dimension: output tiles are (D, tn)
    lane-dense and the MXU runs at full output width.  Big graph tiles
    (tk x tn bf16, double-buffered) keep per-step overhead negligible vs the
    HBM stream of the graph."""
    d, n = e16.shape
    in_specs = [pl.BlockSpec((d, tk), lambda j, k: (0, k)),
                pl.BlockSpec((tk, tn), lambda j, k: (k, j))]
    cp = pltpu.CompilerParams(dimension_semantics=("parallel", "arbitrary"),
                              vmem_limit_bytes=_vmem_limit_bytes())
    if emit_bf16:
        return pl.pallas_call(
            _prop_kernel_dual,
            out_shape=(jax.ShapeDtypeStruct((d, n), jnp.float32),
                       jax.ShapeDtypeStruct((d, n), jnp.bfloat16)),
            grid=(n // tn, n // tk),
            in_specs=in_specs,
            out_specs=(pl.BlockSpec((d, tn), lambda j, k: (0, j)),
                       pl.BlockSpec((d, tn), lambda j, k: (0, j))),
            compiler_params=cp,
        )(e16, g16)
    return pl.pallas_call(
        _prop_kernel,
        out_shape=jax.ShapeDtypeStruct((d, n), jnp.float32),
        grid=(n // tn, n // tk),
        in_specs=in_specs,
        out_specs=pl.BlockSpec((d, tn), lambda j, k: (0, j)),
        compiler_params=cp,
    )(e16, g16)


def _gating_kernel(hard, scal_ref, lin_ref, pre_ref,
                   w1a_ref, w1b_ref, b1_ref, w2d_ref, nd_ref,
                   out_ref, out16_ref):
    lin = lin_ref[...]
    non = _elu(pre_ref[...])                    # non = ELU(G @ prev), fused
    wl = _gate_weight(lin, non, w1a_ref[...], w1b_ref[...], b1_ref[...],
                      w2d_ref[...], nd_ref[...], scal_ref[0], scal_ref[1],
                      scal_ref[2], hard)
    emb = wl * lin + (1.0 - wl) * non           # __choosing_one
    out_ref[...] = emb
    out16_ref[...] = emb.astype(jnp.bfloat16)   # feeds the next propagate


def gating_choose(lin, pre, gate, nd, scal, hard, *, tn):
    d, n = lin.shape
    h = gate[0].shape[0]
    col = lambda s: pl.BlockSpec(s, lambda j: (0, j))
    rep = lambda s: pl.BlockSpec(s, lambda j: (0, 0))
    kern = functools.partial(_gating_kernel, bool(hard))
    return pl.pallas_call(
        kern,
        out_shape=(jax.ShapeDtypeStruct((d, n), jnp.float32),
                   jax.ShapeDtypeStruct((d, n), jnp.bfloat16)),
        grid=(n // tn,),
        in_specs=[pl.BlockSpec(memory_space=pltpu.MemorySpace.SMEM),
                  col((d, tn)), col((d, tn)),
                  rep((h, d)), rep((h, d)), rep((h, 1)), rep((h, 1)),
                  col((1, tn))],
        out_specs=(col((d, tn)), col((d, tn))),
        compiler_params=pltpu.CompilerParams(
            dimension_semantics=("parallel",),
            vmem_limit_bytes=_vmem_limit_bytes()),
    )(scal, lin, pre, gate[0], gate[1], gate[2], gate[3], nd)


def _gating_mean_kernel(hard, scal_ref, lin_ref, e0_ref, l1_ref, l2_ref,
                        p1_ref, w1a_ref, w1b_ref, b1_ref, w2d_ref, nd_ref,
                        out_ref):
    lin = lin_ref[...]
    non = _elu(lin)                             # non2 = ELU(lin4)
    wl = _gate_weight(lin, non, w1a_ref[...], w1b_ref[...], b1_ref[...],
                      w2d_ref[...], nd_ref[...], scal_ref[0], scal_ref[1],
                      scal_ref[2], hard)
    emb2 = wl * lin + (1.0 - wl) * non
    # fused 5-way layer mean: emb2 never round-trips through HBM.
    out_ref[...] = (e0_ref[...] + l1_ref[...] + l2_ref[...] + p1_ref[...]
                    + emb2) * jnp.float32(0.2)


def gating_choose_mean(lin4, e0t, lin1, lin2, emb1, gate, nd, scal, hard, *,
                       tn):
    d, n = lin4.shape
    h = gate[0].shape[0]
    col = lambda s: pl.BlockSpec(s, lambda j: (0, j))
    rep = lambda s: pl.BlockSpec(s, lambda j: (0, 0))
    kern = functools.partial(_gating_mean_kernel, bool(hard))
    return pl.pallas_call(
        kern,
        out_shape=jax.ShapeDtypeStruct((d, n), jnp.float32),
        grid=(n // tn,),
        in_specs=[pl.BlockSpec(memory_space=pltpu.MemorySpace.SMEM),
                  col((d, tn)), col((d, tn)), col((d, tn)), col((d, tn)),
                  col((d, tn)),
                  rep((h, d)), rep((h, d)), rep((h, 1)), rep((h, 1)),
                  col((1, tn))],
        out_specs=col((d, tn)),
        compiler_params=pltpu.CompilerParams(
            dimension_semantics=("parallel",),
            vmem_limit_bytes=_vmem_limit_bytes()),
    )(scal, lin4, e0t, lin1, lin2, emb1,
      gate[0], gate[1], gate[2], gate[3], nd)


def _pad_cols(x, n_pad):
    n = x.shape[-1]
    if n_pad == n:
        return x
    return jnp.pad(x, ((0, 0), (0, n_pad - n)))


def hmlet_forward_tiled(params, g, users, items, gum_temp, div_noise, hard,
                        *, col_tile=1024, k_tile=2048, gate_tile=2048):
    """VMEM-safe tiled path for graphs whose bf16 copy does not fit VMEM.

    All (D, n) intermediates live transposed so the node axis is lane-dense.
    The node count is zero-padded up to the largest tile (so the big-tile path
    is always active); zero rows/cols stay zero through propagation / ELU /
    gating and are sliced off at the end."""
    num_users = params["num_users"]
    e0 = jnp.concatenate([params["user_emb"], params["item_emb"]], axis=0)
    n, d = e0.shape

    pad_to = max(col_tile, k_tile, gate_tile)
    n_pad = pad_to * pl.cdiv(n, pad_to)

    # Cast to bf16 BEFORE padding: halves the HBM traffic of the prep pass.
    g16 = g.astype(jnp.bfloat16)
    if n_pad != n:
        g16 = jnp.pad(g16, ((0, n_pad - n), (0, n_pad - n)))

    g1 = _prep_gate(params["g1_w1"], params["g1_b1"], params["g1_w2"],
                    params["g1_b2"], params["noise1"], d)
    g2 = _prep_gate(params["g2_w1"], params["g2_b1"], params["g2_w2"],
                    params["g2_b2"], params["noise2"], d)
    nd1 = _pad_cols(g1[5], n_pad)
    nd2 = _pad_cols(g2[5], n_pad)
    e0t = _pad_cols(e0.T.astype(jnp.float32), n_pad)

    inv_gum = jnp.float32(1.0 / gum_temp)
    inv_div = jnp.float32(1.0 / div_noise)
    scal1 = jnp.stack([inv_gum, inv_div, g1[4]])
    scal2 = jnp.stack([inv_gum, inv_div, g2[4]])

    lin1, lin1_16 = propagate(g16, e0t.astype(jnp.bfloat16),
                              tn=col_tile, tk=k_tile, emit_bf16=True)
    lin2, lin2_16 = propagate(g16, lin1_16, tn=col_tile, tk=k_tile,
                              emit_bf16=True)
    lin3 = propagate(g16, lin2_16, tn=col_tile, tk=k_tile, emit_bf16=False)
    # non1 = ELU(G @ E0) == ELU(lin1): fused into the gating kernel.
    emb1, emb1_16 = gating_choose(lin3, lin1, g1, nd1, scal1, hard,
                                  tn=gate_tile)
    lin4 = propagate(g16, emb1_16, tn=col_tile, tk=k_tile, emit_bf16=False)
    # gating 2 + __choosing_one + 5-way layer mean, fused.
    light_t = gating_choose_mean(lin4, e0t, lin1, lin2, emb1, g2, nd2, scal2,
                                 hard, tn=gate_tile)

    light_t = light_t[:, :n]
    users_t = light_t[:, users]
    items_t = light_t[:, num_users + items]
    return jnp.sum(users_t * items_t, axis=0)


def hmlet_forward(params, g, users, items, gum_temp, div_noise, hard):
    """Crossover: fused single-kernel path while the bf16 graph + f32 working
    set fits ~half the VMEM budget, else the tiled path.  On v7x the smaller
    64 MiB VMEM (and its 2 TensorCores, which only the tiled path's 'parallel'
    column axis can use) automatically lowers this crossover."""
    n = params["user_emb"].shape[0] + params["item_emb"].shape[0]
    d = params["user_emb"].shape[1]
    fused_bytes = n * n * 2 + 10 * n * d * 4
    if fused_bytes <= _vmem_limit_bytes() // 2:
        return hmlet_forward_fused(params, g, users, items, gum_temp,
                                   div_noise, hard)
    return hmlet_forward_tiled(params, g, users, items, gum_temp, div_noise,
                               hard)


# --------------------------------------------------------------------------
# Pure-JAX reference (PyTorch module in eval mode, with the same bf16 matmul
# operand rounding / f32 accumulation as the kernels)
# --------------------------------------------------------------------------
def hmlet_forward_ref(params, g, users, items, gum_temp, div_noise, hard):
    num_users = params["num_users"]
    bf = lambda x: x.astype(jnp.bfloat16).astype(jnp.float32)
    gb = bf(g)

    def prop(e):
        return gb @ bf(e)

    def elu(x):
        return jnp.where(x > 0, x, jnp.exp(jnp.minimum(x, 0.0)) - 1.0)

    def gate(lin, non, w1, b1, w2, b2, noise):
        concat = jnp.concatenate([bf(lin), bf(non)], axis=-1)
        h = jnp.maximum(concat @ bf(w1) + b1, 0.0)
        logits = bf(h) @ bf(w2) + b2
        y = jax.nn.softmax((logits + noise / div_noise) / gum_temp, axis=-1)
        if hard:
            w_lin = (y[:, 0:1] >= y[:, 1:2]).astype(y.dtype)
            w_non = 1.0 - w_lin
        else:
            w_lin, w_non = y[:, 0:1], y[:, 1:2]
        return w_lin * lin + w_non * non

    e0 = jnp.concatenate([params["user_emb"], params["item_emb"]], axis=0)
    lin1 = prop(e0)
    lin2 = prop(lin1)
    lin3 = prop(lin2)
    non1 = elu(lin1)
    emb1 = gate(lin3, non1, params["g1_w1"], params["g1_b1"],
                params["g1_w2"], params["g1_b2"], params["noise1"])
    lin4 = prop(emb1)
    non2 = elu(lin4)
    emb2 = gate(lin4, non2, params["g2_w1"], params["g2_b1"],
                params["g2_w2"], params["g2_b2"], params["noise2"])
    light = (e0 + lin1 + lin2 + emb1 + emb2) / 5.0
    all_users, all_items = light[:num_users], light[num_users:]
    return jnp.sum(all_users[users] * all_items[items], axis=1)


# --------------------------------------------------------------------------
if __name__ == "__main__":
    num_users, num_items = 96, 160
    N = num_users + num_items            # 256 graph nodes
    D = 64                               # embedding_dim
    H = 32                               # gating_mlp_dims = [32, 2]
    B = 8                                # batch of (user, item) pairs

    key = jax.random.PRNGKey(0)
    ks = jax.random.split(key, 15)

    # Embedding tables (nn.init.normal_(std=0.1))
    user_emb = 0.1 * jax.random.normal(ks[0], (num_users, D), jnp.float32)
    item_emb = 0.1 * jax.random.normal(ks[1], (num_items, D), jnp.float32)

    # Dense symmetric-normalized bipartite adjacency (getSparseGraph stand-in)
    R = (jax.random.uniform(ks[2], (num_users, num_items)) < 0.1).astype(jnp.float32)
    A = jnp.zeros((N, N), jnp.float32)
    A = A.at[:num_users, num_users:].set(R)
    A = A.at[num_users:, :num_users].set(R.T)
    deg = A.sum(axis=1)
    d_inv_sqrt = jnp.where(deg > 0, deg ** -0.5, 0.0)
    G = d_inv_sqrt[:, None] * A * d_inv_sqrt[None, :]

    # Gating_Net parameters (deterministic synthetic init)
    g1_w1 = 0.1 * jax.random.normal(ks[3], (2 * D, H), jnp.float32)
    g1_b1 = 0.05 * jax.random.normal(ks[4], (H,), jnp.float32)
    g1_w2 = 0.1 * jax.random.normal(ks[5], (H, 2), jnp.float32)
    g1_b2 = 0.05 * jax.random.normal(ks[6], (2,), jnp.float32)
    g2_w1 = 0.1 * jax.random.normal(ks[7], (2 * D, H), jnp.float32)
    g2_b1 = 0.05 * jax.random.normal(ks[8], (H,), jnp.float32)
    g2_w2 = 0.1 * jax.random.normal(ks[9], (H, 2), jnp.float32)
    g2_b2 = 0.05 * jax.random.normal(ks[10], (2,), jnp.float32)

    # Deterministic gumbel noise: -log(-log(U + eps) + eps)
    eps = 1e-20
    u1 = jax.random.uniform(ks[11], (N, 2), jnp.float32)
    u2 = jax.random.uniform(ks[12], (N, 2), jnp.float32)
    noise1 = -jnp.log(-jnp.log(u1 + eps) + eps)
    noise2 = -jnp.log(-jnp.log(u2 + eps) + eps)

    params = dict(num_users=num_users, user_emb=user_emb, item_emb=item_emb,
                  g1_w1=g1_w1, g1_b1=g1_b1, g1_w2=g1_w2, g1_b2=g1_b2,
                  g2_w1=g2_w1, g2_b1=g2_b1, g2_w2=g2_w2, g2_b2=g2_b2,
                  noise1=noise1, noise2=noise2)

    users = jax.random.randint(ks[13], (B,), 0, num_users)
    items = jax.random.randint(ks[14], (B,), 0, num_items)

    gum_temp, div_noise, hard = 0.7, 2.0, False

    gamma_fused = jax.block_until_ready(
        hmlet_forward_fused(params, G, users, items, gum_temp, div_noise, hard))
    gamma_tiled = jax.block_until_ready(
        hmlet_forward_tiled(params, G, users, items, gum_temp, div_noise, hard))
    gamma_auto = jax.block_until_ready(
        hmlet_forward(params, G, users, items, gum_temp, div_noise, hard))
    gamma_ref = jax.block_until_ready(
        hmlet_forward_ref(params, G, users, items, gum_temp, div_noise, hard))

    assert gamma_fused.shape == (B,) and gamma_tiled.shape == (B,)
    for name, got in (("fused", gamma_fused), ("tiled", gamma_tiled),
                      ("auto", gamma_auto)):
        if not jnp.allclose(got, gamma_ref, rtol=1e-3, atol=3e-5):
            raise RuntimeError(f"{name} mismatch:\n{got}\nvs\n{gamma_ref}")

    # hard=True path: exercise the argmax one-hot branch (no tight numeric
    # assert -- a legitimate tie flip between kernel and reference is allowed).
    gamma_hard_f = jax.block_until_ready(
        hmlet_forward_fused(params, G, users, items, gum_temp, div_noise, True))
    gamma_hard_t = jax.block_until_ready(
        hmlet_forward_tiled(params, G, users, items, gum_temp, div_noise, True))
    assert gamma_hard_f.shape == (B,) and gamma_hard_t.shape == (B,)
    assert bool(jnp.all(jnp.isfinite(gamma_hard_f)))
    assert bool(jnp.all(jnp.isfinite(gamma_hard_t)))

    print("KERNEL_OK")
</pallas_src>

<mosaic_0001>
module attributes {stable_mosaic.version = 11 : i64} {
  func.func @_fused_kernel(%arg0: memref<4xf32, #tpu.memory_space<smem>>, %arg1: memref<256x256xbf16, #tpu.memory_space<vmem>>, %arg2: memref<64x256xf32, #tpu.memory_space<vmem>>, %arg3: memref<32x64xbf16, #tpu.memory_space<vmem>>, %arg4: memref<32x64xbf16, #tpu.memory_space<vmem>>, %arg5: memref<32x1xf32, #tpu.memory_space<vmem>>, %arg6: memref<32x1xf32, #tpu.memory_space<vmem>>, %arg7: memref<1x256xf32, #tpu.memory_space<vmem>>, %arg8: memref<32x64xbf16, #tpu.memory_space<vmem>>, %arg9: memref<32x64xbf16, #tpu.memory_space<vmem>>, %arg10: memref<32x1xf32, #tpu.memory_space<vmem>>, %arg11: memref<32x1xf32, #tpu.memory_space<vmem>>, %arg12: memref<1x256xf32, #tpu.memory_space<vmem>>, %arg13: memref<64x256xf32, #tpu.memory_space<vmem>>) attributes {dimension_semantics = [], scalar_prefetch = 0 : i64, scratch_operands = 0 : i64, tpu.core_type = #tpu.core_type<tc>} {
    %c0 = arith.constant 0 : index
    %0 = memref.load %arg0[%c0] : memref<4xf32, #tpu.memory_space<smem>>
    %c1 = arith.constant 1 : index
    %1 = memref.load %arg0[%c1] : memref<4xf32, #tpu.memory_space<smem>>
    %c2 = arith.constant 2 : index
    %2 = memref.load %arg0[%c2] : memref<4xf32, #tpu.memory_space<smem>>
    %c3 = arith.constant 3 : index
    %3 = memref.load %arg0[%c3] : memref<4xf32, #tpu.memory_space<smem>>
    %c0_0 = arith.constant 0 : index
    %c0_1 = arith.constant 0 : index
    %4 = vector.load %arg1[%c0_0, %c0_1] : memref<256x256xbf16, #tpu.memory_space<vmem>>, vector<256x256xbf16>
    %c0_2 = arith.constant 0 : index
    %c0_3 = arith.constant 0 : index
    %5 = vector.load %arg2[%c0_2, %c0_3] : memref<64x256xf32, #tpu.memory_space<vmem>>, vector<64x256xf32>
    %6 = arith.truncf %5 : vector<64x256xf32> to vector<64x256xbf16>
    %cst = arith.constant dense<0.000000e+00> : vector<64x256xf32>
    %7 = tpu.matmul %6, %4, %cst {dimension_numbers = #tpu.dot_dimension_numbers<[1], [0], [0], [1], [0, 0, 1, 1], [], []>} : vector<64x256xbf16>, vector<256x256xbf16>, vector<64x256xf32> -> vector<64x256xf32>
    %8 = arith.addf %5, %7 : vector<64x256xf32>
    %9 = arith.truncf %7 : vector<64x256xf32> to vector<64x256xbf16>
    %cst_4 = arith.constant dense<0.000000e+00> : vector<64x256xf32>
    %10 = tpu.matmul %9, %4, %cst_4 {dimension_numbers = #tpu.dot_dimension_numbers<[1], [0], [0], [1], [0, 0, 1, 1], [], []>} : vector<64x256xbf16>, vector<256x256xbf16>, vector<64x256xf32> -> vector<64x256xf32>
    %11 = arith.addf %8, %10 : vector<64x256xf32>
    %cst_5 = arith.constant 0.000000e+00 : f32
    %12 = vector.broadcast %cst_5 : f32 to vector<64x256xf32>
    %13 = arith.cmpf ogt, %7, %12 : vector<64x256xf32>
    %cst_6 = arith.constant 0.000000e+00 : f32
    %14 = vector.broadcast %cst_6 : f32 to vector<64x256xf32>
    %15 = arith.minimumf %7, %14 : vector<64x256xf32>
    %16 = math.exp %15 : vector<64x256xf32>
    %cst_7 = arith.constant 1.000000e+00 : f32
    %17 = vector.broadcast %cst_7 : f32 to vector<64x256xf32>
    %18 = arith.subf %16, %17 : vector<64x256xf32>
    %19 = arith.select %13, %7, %18 : vector<64x256xi1>, vector<64x256xf32>
    %20 = arith.truncf %10 : vector<64x256xf32> to vector<64x256xbf16>
    %cst_8 = arith.constant dense<0.000000e+00> : vector<64x256xf32>
    %21 = tpu.matmul %20, %4, %cst_8 {dimension_numbers = #tpu.dot_dimension_numbers<[1], [0], [0], [1], [0, 0, 1, 1], [], []>} : vector<64x256xbf16>, vector<256x256xbf16>, vector<64x256xf32> -> vector<64x256xf32>
    %c0_9 = arith.constant 0 : index
    %c0_10 = arith.constant 0 : index
    %22 = vector.load %arg3[%c0_9, %c0_10] : memref<32x64xbf16, #tpu.memory_space<vmem>>, vector<32x64xbf16>
    %c0_11 = arith.constant 0 : index
    %c0_12 = arith.constant 0 : index
    %23 = vector.load %arg4[%c0_11, %c0_12] : memref<32x64xbf16, #tpu.memory_space<vmem>>, vector<32x64xbf16>
    %c0_13 = arith.constant 0 : index
    %c0_14 = arith.constant 0 : index
    %24 = vector.load %arg5[%c0_13, %c0_14] : memref<32x1xf32, #tpu.memory_space<vmem>>, vector<32x1xf32>
    %c0_15 = arith.constant 0 : index
    %c0_16 = arith.constant 0 : index
    %25 = vector.load %arg6[%c0_15, %c0_16] : memref<32x1xf32, #tpu.memory_space<vmem>>, vector<32x1xf32>
    %c0_17 = arith.constant 0 : index
    %c0_18 = arith.constant 0 : index
    %26 = vector.load %arg7[%c0_17, %c0_18] : memref<1x256xf32, #tpu.memory_space<vmem>>, vector<1x256xf32>
    %27 = arith.truncf %21 : vector<64x256xf32> to vector<64x256xbf16>
    %cst_19 = arith.constant dense<0.000000e+00> : vector<32x256xf32>
    %28 = tpu.matmul %22, %27, %cst_19 {dimension_numbers = #tpu.dot_dimension_numbers<[1], [0], [0], [1], [0, 0, 1, 1], [], []>} : vector<32x64xbf16>, vector<64x256xbf16>, vector<32x256xf32> -> vector<32x256xf32>
    %29 = arith.truncf %19 : vector<64x256xf32> to vector<64x256xbf16>
    %cst_20 = arith.constant dense<0.000000e+00> : vector<32x256xf32>
    %30 = tpu.matmul %23, %29, %cst_20 {dimension_numbers = #tpu.dot_dimension_numbers<[1], [0], [0], [1], [0, 0, 1, 1], [], []>} : vector<32x64xbf16>, vector<64x256xbf16>, vector<32x256xf32> -> vector<32x256xf32>
    %31 = arith.addf %28, %30 : vector<32x256xf32>
    %32 = vector.broadcast %24 : vector<32x1xf32> to vector<32x256xf32>
    %33 = arith.addf %31, %32 : vector<32x256xf32>
    %cst_21 = arith.constant 0.000000e+00 : f32
    %34 = vector.broadcast %cst_21 : f32 to vector<32x256xf32>
    %35 = arith.maximumf %33, %34 : vector<32x256xf32>
    %36 = arith.truncf %35 : vector<32x256xf32> to vector<32x256xbf16>
    %37 = arith.extf %36 : vector<32x256xbf16> to vector<32x256xf32>
    %38 = vector.broadcast %25 : vector<32x1xf32> to vector<32x256xf32>
    %39 = arith.mulf %37, %38 : vector<32x256xf32>
    %cst_22 = arith.constant dense<0.000000e+00> : vector<256xf32>
    %40 = vector.multi_reduction <add>, %39, %cst_22 [0] : vector<32x256xf32> to vector<256xf32>
    %41 = vector.shape_cast %40 : vector<256xf32> to vector<1x256xf32>
    %42 = vector.broadcast %2 : f32 to vector<1x256xf32>
    %43 = arith.addf %41, %42 : vector<1x256xf32>
    %44 = vector.broadcast %1 : f32 to vector<1x256xf32>
    %45 = arith.mulf %26, %44 : vector<1x256xf32>
    %46 = arith.addf %43, %45 : vector<1x256xf32>
    %47 = vector.broadcast %0 : f32 to vector<1x256xf32>
    %48 = arith.mulf %46, %47 : vector<1x256xf32>
    %cst_23 = arith.constant 0.000000e+00 : f32
    %49 = vector.broadcast %cst_23 : f32 to vector<1x256xf32>
    %50 = arith.subf %49, %48 : vector<1x256xf32>
    %51 = math.exp %50 : vector<1x256xf32>
    %cst_24 = arith.constant 1.000000e+00 : f32
    %52 = vector.broadcast %cst_24 : f32 to vector<1x256xf32>
    %53 = arith.addf %52, %51 : vector<1x256xf32>
    %cst_25 = arith.constant 1.000000e+00 : f32
    %54 = vector.broadcast %cst_25 : f32 to vector<1x256xf32>
    %55 = arith.divf %54, %53 : vector<1x256xf32>
    %56 = vector.broadcast %55 : vector<1x256xf32> to vector<64x256xf32>
    %57 = arith.mulf %56, %21 : vector<64x256xf32>
    %cst_26 = arith.constant 1.000000e+00 : f32
    %58 = vector.broadcast %cst_26 : f32 to vector<1x256xf32>
    %59 = arith.subf %58, %55 : vector<1x256xf32>
    %60 = vector.broadcast %59 : vector<1x256xf32> to vector<64x256xf32>
    %61 = arith.mulf %60, %19 : vector<64x256xf32>
    %62 = arith.addf %57, %61 : vector<64x256xf32>
    %63 = arith.addf %11, %62 : vector<64x256xf32>
    %64 = arith.truncf %62 : vector<64x256xf32> to vector<64x256xbf16>
    %cst_27 = arith.constant dense<0.000000e+00> : vector<64x256xf32>
    %65 = tpu.matmul %64, %4, %cst_27 {dimension_numbers = #tpu.dot_dimension_numbers<[1], [0], [0], [1], [0, 0, 1, 1], [], []>} : vector<64x256xbf16>, vector<256x256xbf16>, vector<64x256xf32> -> vector<64x256xf32>
    %cst_28 = arith.constant 0.000000e+00 : f32
    %66 = vector.broadcast %cst_28 : f32 to vector<64x256xf32>
    %67 = arith.cmpf ogt, %65, %66 : vector<64x256xf32>
    %cst_29 = arith.constant 0.000000e+00 : f32
    %68 = vector.broadcast %cst_29 : f32 to vector<64x256xf32>
    %69 = arith.minimumf %65, %68 : vector<64x256xf32>
    %70 = math.exp %69 : vector<64x256xf32>
    %cst_30 = arith.constant 1.000000e+00 : f32
    %71 = vector.broadcast %cst_30 : f32 to vector<64x256xf32>
    %72 = arith.subf %70, %71 : vector<64x256xf32>
    %73 = arith.select %67, %65, %72 : vector<64x256xi1>, vector<64x256xf32>
    %c0_31 = arith.constant 0 : index
    %c0_32 = arith.constant 0 : index
    %74 = vector.load %arg8[%c0_31, %c0_32] : memref<32x64xbf16, #tpu.memory_space<vmem>>, vector<32x64xbf16>
    %c0_33 = arith.constant 0 : index
    %c0_34 = arith.constant 0 : index
    %75 = vector.load %arg9[%c0_33, %c0_34] : memref<32x64xbf16, #tpu.memory_space<vmem>>, vector<32x64xbf16>
    %c0_35 = arith.constant 0 : index
    %c0_36 = arith.constant 0 : index
    %76 = vector.load %arg10[%c0_35, %c0_36] : memref<32x1xf32, #tpu.memory_space<vmem>>, vector<32x1xf32>
    %c0_37 = arith.constant 0 : index
    %c0_38 = arith.constant 0 : index
    %77 = vector.load %arg11[%c0_37, %c0_38] : memref<32x1xf32, #tpu.memory_space<vmem>>, vector<32x1xf32>
    %c0_39 = arith.constant 0 : index
    %c0_40 = arith.constant 0 : index
    %78 = vector.load %arg12[%c0_39, %c0_40] : memref<1x256xf32, #tpu.memory_space<vmem>>, vector<1x256xf32>
    %79 = arith.truncf %65 : vector<64x256xf32> to vector<64x256xbf16>
    %cst_41 = arith.constant dense<0.000000e+00> : vector<32x256xf32>
    %80 = tpu.matmul %74, %79, %cst_41 {dimension_numbers = #tpu.dot_dimension_numbers<[1], [0], [0], [1], [0, 0, 1, 1], [], []>} : vector<32x64xbf16>, vector<64x256xbf16>, vector<32x256xf32> -> vector<32x256xf32>
    %81 = arith.truncf %73 : vector<64x256xf32> to vector<64x256xbf16>
    %cst_42 = arith.constant dense<0.000000e+00> : vector<32x256xf32>
    %82 = tpu.matmul %75, %81, %cst_42 {dimension_numbers = #tpu.dot_dimension_numbers<[1], [0], [0], [1], [0, 0, 1, 1], [], []>} : vector<32x64xbf16>, vector<64x256xbf16>, vector<32x256xf32> -> vector<32x256xf32>
    %83 = arith.addf %80, %82 : vector<32x256xf32>
    %84 = vector.broadcast %76 : vector<32x1xf32> to vector<32x256xf32>
    %85 = arith.addf %83, %84 : vector<32x256xf32>
    %cst_43 = arith.constant 0.000000e+00 : f32
    %86 = vector.broadcast %cst_43 : f32 to vector<32x256xf32>
    %87 = arith.maximumf %85, %86 : vector<32x256xf32>
    %88 = arith.truncf %87 : vector<32x256xf32> to vector<32x256xbf16>
    %89 = arith.extf %88 : vector<32x256xbf16> to vector<32x256xf32>
    %90 = vector.broadcast %77 : vector<32x1xf32> to vector<32x256xf32>
    %91 = arith.mulf %89, %90 : vector<32x256xf32>
    %cst_44 = arith.constant dense<0.000000e+00> : vector<256xf32>
    %92 = vector.multi_reduction <add>, %91, %cst_44 [0] : vector<32x256xf32> to vector<256xf32>
    %93 = vector.shape_cast %92 : vector<256xf32> to vector<1x256xf32>
    %94 = vector.broadcast %3 : f32 to vector<1x256xf32>
    %95 = arith.addf %93, %94 : vector<1x256xf32>
    %96 = vector.broadcast %1 : f32 to vector<1x256xf32>
    %97 = arith.mulf %78, %96 : vector<1x256xf32>
    %98 = arith.addf %95, %97 : vector<1x256xf32>
    %99 = vector.broadcast %0 : f32 to vector<1x256xf32>
    %100 = arith.mulf %98, %99 : vector<1x256xf32>
    %cst_45 = arith.constant 0.000000e+00 : f32
    %101 = vector.broadcast %cst_45 : f32 to vector<1x256xf32>
    %102 = arith.subf %101, %100 : vector<1x256xf32>
    %103 = math.exp %102 : vector<1x256xf32>
    %cst_46 = arith.constant 1.000000e+00 : f32
    %104 = vector.broadcast %cst_46 : f32 to vector<1x256xf32>
    %105 = arith.addf %104, %103 : vector<1x256xf32>
    %cst_47 = arith.constant 1.000000e+00 : f32
    %106 = vector.broadcast %cst_47 : f32 to vector<1x256xf32>
    %107 = arith.divf %106, %105 : vector<1x256xf32>
    %108 = vector.broadcast %107 : vector<1x256xf32> to vector<64x256xf32>
    %109 = arith.mulf %108, %65 : vector<64x256xf32>
    %cst_48 = arith.constant 1.000000e+00 : f32
    %110 = vector.broadcast %cst_48 : f32 to vector<1x256xf32>
    %111 = arith.subf %110, %107 : vector<1x256xf32>
    %112 = vector.broadcast %111 : vector<1x256xf32> to vector<64x256xf32>
    %113 = arith.mulf %112, %73 : vector<64x256xf32>
    %114 = arith.addf %109, %113 : vector<64x256xf32>
    %115 = arith.addf %63, %114 : vector<64x256xf32>
    %cst_49 = arith.constant 2.000000e-01 : f32
    %116 = vector.broadcast %cst_49 : f32 to vector<64x256xf32>
    %117 = arith.mulf %115, %116 : vector<64x256xf32>
    %c0_50 = arith.constant 0 : index
    %c0_51 = arith.constant 0 : index
    %118 = vector.load %arg13[%c0_50, %c0_51] : memref<64x256xf32, #tpu.memory_space<vmem>>, vector<64x256xf32>
    tpu.vector_store %arg13[%c0_50, %c0_51], %117 {strides = array<i32>} : memref<64x256xf32, #tpu.memory_space<vmem>>, vector<64x256xf32>,
    return
  }
}

</mosaic_0001>

<bundles_post_ra>
// kernel: tpu_custom_call.1
= control target key start
LH: loop header
LB: loop body
LE: loop exit
PB: predicated region body
PF: predicated region fallthrough
CT: control target
= control target key end

     0   :  { %18 = vsyncpa [#allocation5], 0  ;;  %s3158_s0 = inlined_call_operand.hbm [shape: f32[4], index: 0, kind: input, shape index: {}]   ;;  %s3159_s1 = inlined_call_operand.hbm [shape: bf16[256,256], index: 1, kind: input, shape index: {}]   ;;  %s3160_s2 = inlined_call_operand.vmem [shape: f32[64,256], index: 2, kind: input, shape index: {}]   ;;  %s3161_s3 = inlined_call_operand.hbm [shape: bf16[32,64], index: 3, kind: input, shape index: {}]   ;;  %s3162_s4 = inlined_call_operand.vmem [shape: bf16[32,64], index: 4, kind: input, shape index: {}]   ;;  %s3163_s5 = inlined_call_operand.vmem [shape: f32[32,1], index: 5, kind: input, shape index: {}]   ;;  %s3164_s6 = inlined_call_operand.vmem [shape: f32[32,1], index: 6, kind: input, shape index: {}]   ;;  %s3165_s7 = inlined_call_operand.vmem [shape: f32[1,256], index: 7, kind: input, shape index: {}]   ;;  %s3166_s8 = inlined_call_operand.vmem [shape: bf16[32,64], index: 8, kind: input, shape index: {}]   ;;  %s3167_s9 = inlined_call_operand.hbm [shape: bf16[32,64], index: 9, kind: input, shape index: {}]   ;;  %s3168_s10 = inlined_call_operand.vmem [shape: f32[32,1], index: 10, kind: input, shape index: {}]   ;;  %s3169_s11 = inlined_call_operand.vmem [shape: f32[32,1], index: 11, kind: input, shape index: {}]   ;;  %s3170_s12 = inlined_call_operand.vmem [shape: f32[1,256], index: 12, kind: input, shape index: {}]   ;;  %s3171_s13 = inlined_call_operand.hbm [shape: f32[64,256], index: 13, kind: output, shape index: {}]  }
   0x1   :  { %19 = vsyncpa [#allocation3], 0 }
   0x2   :  { %20 = vsyncpa [#allocation8], 0 }
   0x3   :  { %21 = vsyncpa [#allocation4], 0  ;;  %s2023_s25 = smov [#allocation7]   ;;  %s1917_s29 = scalar_lea.hbm %s3161_s3, 256 }
   0x4   :  { %s49_s26 = sshll.u32 %s2023_s25, 4  ;;  %p1918_p0 = scmp.ne.s32.totalorder %s3161_s3, %s1917_s29  ;;  %s50_s26 = int_to_ptr.vmem [resolvable:$true] %s49_s26 }
   0x5   :  { %p1921_p1 = scmp.lt.u32.totalorder %s1917_s29, %s3161_s3 }
   0x7   :  { %p1923_p2 = pnand %p1921_p1, %p1918_p0 }
   0x9   :  { %1926 = shalt.err (!%p1923_p2)
}
   0xa   :  { %s1927_s17 = scalar_lea.vmem %s50_s26, 256  ;;  %p1932_p4 = scmp.lt.s32.totalorder %s50_s26, %s50_s26 }
   0xb   :  { %p1928_p3 = scmp.ne.s32.totalorder %s50_s26, %s1927_s17  ;;  %p1933_p5 = scmp.lt.s32.totalorder %s1927_s17, %s1927_s17 }
   0xd   :  { %p1934_p6 = por %p1933_p5, %p1932_p4 }
   0xf   :  { %p1935_p7 = pnand %p1934_p6, %p1928_p3 }
  0x11   :  { %1938 = shalt.err (!%p1935_p7)
}
  0x12   :  { %s2024_s18 = smov 64   ;;  %s2025_s19 = smov 4  }
  0x13   :  { %55 = dma.hbm_to_vmem [thread:$0]  %s3161_s3, 256, %s50_s26, [#allocation8], %s2024_s18, %s2024_s18, %s2025_s19  }
  0x14   :  { %s1939_s24 = scalar_lea.hbm %s3158_s0, 16 }
  0x15   :  { %p1940_p8 = scmp.ne.s32.totalorder %s3158_s0, %s1939_s24  ;;  %p1943_p9 = scmp.lt.u32.totalorder %s1939_s24, %s3158_s0 }
  0x17   :  { %p1945_p10 = pnand %p1943_p9, %p1940_p8 }
  0x19   :  { %1948 = shalt.err (!%p1945_p10)
}
  0x1a   :  { %s2026_s30 = smov [#allocation2]   ;;  %s2027_s3 = smov [#allocation6]  }
  0x1b   :  { %29 = dma.hbm_to_smem %s3158_s0, 16, %s2026_s30, [#allocation5]  }
  0x1c   :  { %s35_s26 = sshll.u32 %s2027_s3, 4  ;;  %s1949_s20 = scalar_lea.hbm %s3159_s1, 4096  ;;  %s36_s26 = int_to_ptr.vmem [resolvable:$true] %s35_s26 }
  0x1d   :  { %p1950_p11 = scmp.ne.s32.totalorder %s3159_s1, %s1949_s20  ;;  %p1953_p12 = scmp.lt.u32.totalorder %s1949_s20, %s3159_s1 }
  0x1f   :  { %p1955_p13 = pnand %p1953_p12, %p1950_p11 }
  0x21   :  { %1958 = shalt.err (!%p1955_p13)
}
  0x22   :  { %s1959_s25 = scalar_lea.vmem %s36_s26, 4096  ;;  %p1964_p1 = scmp.lt.s32.totalorder %s36_s26, %s36_s26 }
  0x23   :  { %p1960_p0 = scmp.ne.s32.totalorder %s36_s26, %s1959_s25  ;;  %p1965_p2 = scmp.lt.s32.totalorder %s1959_s25, %s1959_s25 }
  0x25   :  { %p1966_p3 = por %p1965_p2, %p1964_p1 }
  0x27   :  { %p1967_p4 = pnand %p1966_p3, %p1960_p0 }
  0x29   :  { %1970 = shalt.err (!%p1967_p4)
}
  0x2a   :  { %s2028_s0 = smov 128   ;;  %s2029_s27 = smov 8  }
  0x2b   :  { %41 = dma.hbm_to_vmem [thread:$0]  %s3159_s1, 4096, %s36_s26, [#allocation3], %s2028_s0, %s2028_s0, %s2029_s27  }
  0x2c   :  { %s2030_s30 = smov [#allocation9]   ;;  %s1971_s16 = scalar_lea.hbm %s3167_s9, 256 }
  0x2d   :  { %s71_s14 = sshll.u32 %s2030_s30, 4  ;;  %p1972_p5 = scmp.ne.s32.totalorder %s3167_s9, %s1971_s16  ;;  %s72_s14 = int_to_ptr.vmem [resolvable:$true] %s71_s14 }
  0x2e   :  { %p1975_p6 = scmp.lt.u32.totalorder %s1971_s16, %s3167_s9 }
  0x30   :  { %p1977_p7 = pnand %p1975_p6, %p1972_p5 }
  0x32   :  { %1980 = shalt.err (!%p1977_p7)
}
  0x33   :  { %s1981_s23 = scalar_lea.vmem %s72_s14, 256  ;;  %p1986_p9 = scmp.lt.s32.totalorder %s72_s14, %s72_s14 }
  0x34   :  { %p1982_p8 = scmp.ne.s32.totalorder %s72_s14, %s1981_s23  ;;  %p1987_p10 = scmp.lt.s32.totalorder %s1981_s23, %s1981_s23 }
  0x36   :  { %p1988_p11 = por %p1987_p10, %p1986_p9 }
  0x38   :  { %p1989_p12 = pnand %p1988_p11, %p1982_p8 }
  0x3a   :  { %1992 = shalt.err (!%p1989_p12)
}
  0x3b   :  { %77 = dma.hbm_to_vmem [thread:$0]  %s3167_s9, 256, %s72_s14, [#allocation8], %s2024_s18, %s2024_s18, %s2025_s19  }
  0x3c   :  { %2015 = dma.done.wait [#allocation5], 16  }
  0x3d   :  { %2016 = vsyncadd [#allocation5], 4294967280 }
  0x3e   :  { %2017 = dma.done.wait [#allocation3], 4096  }
  0x3f   :  { %2018 = vsyncadd [#allocation3], 4294963200 }
  0x40   :  { %2019 = dma.done.wait [#allocation8], 512  }
  0x41   :  { %2020 = vsyncadd [#allocation8], 4294966784 }
  0x42   :  { %96 = sfence }
  0x43   :  { %v2159_v0 = vld [vmem:[#allocation6 + $0x4] ss:$8 sps:$4 sm:$0xff]   ;;  %v2161_v1 = vld [vmem:[#allocation6] ss:$8 sps:$4 sm:$0xff]   ;;  %v2164_v2 = vld [vmem:[#allocation6 + $0x14] ss:$8 sps:$4 sm:$0xff]  }
  0x44   :  { %318 = vmatprep.subr.bf16.mxu0 %v2159_v0  ;;  %415 = vmatprep.subr.bf16.mxu1 %v2159_v0  ;;  %v2168_v3 = vld [vmem:[#allocation6 + $0x10] ss:$8 sps:$4 sm:$0xff]   ;;  %v2172_v4 = vld [vmem:[#allocation6 + $0x24] ss:$8 sps:$4 sm:$0xff]   ;;  %v2176_v5 = vld [vmem:[#allocation6 + $0x20] ss:$8 sps:$4 sm:$0xff]  }
  0x45   :  { %319 = vmatpush1.bf16.msra.mxu0 %v2161_v1  ;;  %416 = vmatpush1.bf16.msra.mxu1 %v2161_v1  ;;  %v2180_v6 = vld [vmem:[#allocation6 + $0x34] ss:$8 sps:$4 sm:$0xff]   ;;  %v2184_v7 = vld [vmem:[#allocation6 + $0x30] ss:$8 sps:$4 sm:$0xff]   ;;  %v2188_v8 = vld [vmem:[#allocation6 + $0x44] ss:$8 sps:$4 sm:$0xff]  }
  0x46   :  { %320 = vmatprep.subr.bf16.mxu0 %v2164_v2  ;;  %417 = vmatprep.subr.bf16.mxu1 %v2164_v2  ;;  %v2192_v9 = vld [vmem:[#allocation6 + $0x40] ss:$8 sps:$4 sm:$0xff]   ;;  %v2196_v10 = vld [vmem:[#allocation6 + $0x54] ss:$8 sps:$4 sm:$0xff]   ;;  %v2200_v11 = vld [vmem:[#allocation6 + $0x50] ss:$8 sps:$4 sm:$0xff]  }
  0x47   :  { %v2204_v12 = vld [vmem:[#allocation6 + $0x64] ss:$8 sps:$4 sm:$0xff]   ;;  %v2215_v14 = vld [vmem:[%s3160_s2 + $0x18] sm:$0xff]  ;;  %v2220_v16 = vld [vmem:[#allocation6 + $0x60] ss:$8 sps:$4 sm:$0xff]   ;;  %s98_s18 = sld [smem:[#allocation2]] }
  0x48   :  { %v2210_v13 = vld [vmem:[%s3160_s2 + $0x8] sm:$0xff]  ;;  %v2224_v17 = vld [vmem:[#allocation6 + $0x74] ss:$8 sps:$4 sm:$0xff]   ;;  %v2227_v18 = vld [vmem:[#allocation6 + $0x70] ss:$8 sps:$4 sm:$0xff]  }
  0x49   :  { %321 = vmatpush1.bf16.msra.mxu0 %v2168_v3  ;;  %418 = vmatpush1.bf16.msra.mxu1 %v2168_v3  ;;  %v151_v15 = vpack.c.bf16 %v2215_v14, %v2210_v13  ;;  %v2229_v19 = vld [vmem:[#allocation6 + $0x84] ss:$8 sps:$4 sm:$0xff]   ;;  %v2235_v20 = vld [vmem:[#allocation6 + $0x80] ss:$8 sps:$4 sm:$0xff]   ;;  %v2240_v21 = vld [vmem:[#allocation6 + $0x94] ss:$8 sps:$4 sm:$0xff]  }
  0x4a   :  { %322 = vmatprep.subr.bf16.mxu0 %v2172_v4  ;;  %419 = vmatprep.subr.bf16.mxu1 %v2172_v4  ;;  %3213 = vst [vmem:[#allocation15_spill] sm:$0xff] %v2229_v19  ;;  %3214 = vst [vmem:[#allocation16_spill] sm:$0xff] %v2235_v20  ;;  %v2244_v22 = vld [vmem:[#allocation6 + $0x90] ss:$8 sps:$4 sm:$0xff]   ;;  %v2248_v23 = vld [vmem:[#allocation6 + $0xa4] ss:$8 sps:$4 sm:$0xff]  }
  0x4b   :  { %350 = vmatprep.mubr.bf16.mxu0 %v151_v15  ;;  %3215 = vst [vmem:[#allocation17_spill] sm:$0xff] %v2240_v21  ;;  %3216 = vst [vmem:[#allocation18_spill] sm:$0xff] %v2244_v22  ;;  %v2252_v24 = vld [vmem:[#allocation6 + $0xa0] ss:$8 sps:$4 sm:$0xff]   ;;  %v2256_v25 = vld [vmem:[#allocation6 + $0xb4] ss:$8 sps:$4 sm:$0xff]  }
  0x4c   :  { %3217 = vst [vmem:[#allocation19_spill] sm:$0xff] %v2248_v23  ;;  %3218 = vst [vmem:[#allocation20_spill] sm:$0xff] %v2252_v24  ;;  %v2260_v26 = vld [vmem:[#allocation6 + $0xb0] ss:$8 sps:$4 sm:$0xff]   ;;  %v2264_v27 = vld [vmem:[#allocation6 + $0xc4] ss:$8 sps:$4 sm:$0xff]  }
  0x4d   :  { %323 = vmatpush1.bf16.msra.mxu0 %v2176_v5  ;;  %420 = vmatpush1.bf16.msra.mxu1 %v2176_v5  ;;  %3219 = vst [vmem:[#allocation21_spill] sm:$0xff] %v2256_v25  ;;  %3220 = vst [vmem:[#allocation22_spill] sm:$0xff] %v2260_v26  ;;  %v2268_v28 = vld [vmem:[#allocation6 + $0xc0] ss:$8 sps:$4 sm:$0xff]   ;;  %v2272_v29 = vld [vmem:[#allocation6 + $0xd4] ss:$8 sps:$4 sm:$0xff]  }
  0x4e   :  { %324 = vmatprep.subr.bf16.mxu0 %v2180_v6  ;;  %421 = vmatprep.subr.bf16.mxu1 %v2180_v6  ;;  %3221 = vst [vmem:[#allocation23_spill] sm:$0xff] %v2264_v27  ;;  %3222 = vst [vmem:[#allocation24_spill] sm:$0xff] %v2268_v28  ;;  %v2276_v30 = vld [vmem:[#allocation6 + $0xd0] ss:$8 sps:$4 sm:$0xff]   ;;  %v2280_v31 = vld [vmem:[#allocation6 + $0xe4] ss:$8 sps:$4 sm:$0xff]  }
  0x4f   :  { %3223 = vst [vmem:[#allocation25_spill] sm:$0xff] %v2272_v29  ;;  %3224 = vst [vmem:[#allocation26_spill] sm:$0xff] %v2276_v30  ;;  %v2284_v32 = vld [vmem:[#allocation6 + $0xe0] ss:$8 sps:$4 sm:$0xff]   ;;  %v2288_v33 = vld [vmem:[#allocation6 + $0xf4] ss:$8 sps:$4 sm:$0xff]  }
  0x50   :  { %3225 = vst [vmem:[#allocation27_spill] sm:$0xff] %v2280_v31  ;;  %3226 = vst [vmem:[#allocation28_spill] sm:$0xff] %v2284_v32  ;;  %v2292_v34 = vld [vmem:[#allocation6 + $0xf0] ss:$8 sps:$4 sm:$0xff]   ;;  %v2297_v35 = vld [vmem:[%s3160_s2] sm:$0xff] }
  0x51   :  { %325 = vmatpush1.bf16.msra.mxu0 %v2184_v7  ;;  %422 = vmatpush1.bf16.msra.mxu1 %v2184_v7  ;;  %3227 = vst [vmem:[#allocation29_spill] sm:$0xff] %v2288_v33  ;;  %3228 = vst [vmem:[#allocation30_spill] sm:$0xff] %v2292_v34  ;;  %v2302_v36 = vld [vmem:[%s3160_s2 + $0x10] sm:$0xff]  ;;  %v2309_v37 = vld [vmem:[%s3160_s2 + $0x28] sm:$0xff] }
  0x52   :  { %326 = vmatprep.subr.bf16.mxu0 %v2188_v8  ;;  %423 = vmatprep.subr.bf16.mxu1 %v2188_v8  ;;  %v2314_v38 = vld [vmem:[%s3160_s2 + $0x38] sm:$0xff]  ;;  %v150_v39 = vpack.c.bf16 %v2302_v36, %v2297_v35  ;;  %v2327_v41 = vld [vmem:[%s3160_s2 + $0x20] sm:$0xff]  ;;  %v2332_v42 = vld [vmem:[%s3160_s2 + $0x30] sm:$0xff] }
  0x53   :  { %v153_v40 = vpack.c.bf16 %v2314_v38, %v2309_v37  ;;  %v2338_v43 = vld [vmem:[%s3160_s2 + $0x48] sm:$0xff]  ;;  %v2343_v44 = vld [vmem:[%s3160_s2 + $0x58] sm:$0xff]  ;;  %v152_v45 = vpack.c.bf16 %v2332_v42, %v2327_v41  ;;  %v2355_v47 = vld [vmem:[%s3160_s2 + $0x40] sm:$0xff] }
  0x54   :  { %v155_v46 = vpack.c.bf16 %v2343_v44, %v2338_v43  ;;  %v2360_v48 = vld [vmem:[%s3160_s2 + $0x50] sm:$0xff]  ;;  %v2366_v49 = vld [vmem:[%s3160_s2 + $0x68] sm:$0xff]  ;;  %v2371_v50 = vld [vmem:[%s3160_s2 + $0x78] sm:$0xff] }
  0x55   :  { %327 = vmatpush1.bf16.msra.mxu0 %v2192_v9  ;;  %424 = vmatpush1.bf16.msra.mxu1 %v2192_v9  ;;  %v154_v51 = vpack.c.bf16 %v2360_v48, %v2355_v47  ;;  %v157_v52 = vpack.c.bf16 %v2371_v50, %v2366_v49  ;;  %v2383_v53 = vld [vmem:[%s3160_s2 + $0x60] sm:$0xff]  ;;  %v2388_v54 = vld [vmem:[%s3160_s2 + $0x70] sm:$0xff] }
  0x56   :  { %328 = vmatprep.subr.bf16.mxu0 %v2196_v10  ;;  %425 = vmatprep.subr.bf16.mxu1 %v2196_v10  ;;  %v156_v55 = vpack.c.bf16 %v2388_v54, %v2383_v53 }
  0x59   :  { %329 = vmatpush1.bf16.msra.mxu0 %v2200_v11  ;;  %426 = vmatpush1.bf16.msra.mxu1 %v2200_v11 }
  0x5a   :  { %330 = vmatprep.subr.bf16.mxu0 %v2204_v12  ;;  %427 = vmatprep.subr.bf16.mxu1 %v2204_v12 }
  0x5d   :  { %331 = vmatpush1.bf16.msra.mxu0 %v2220_v16  ;;  %428 = vmatpush1.bf16.msra.mxu1 %v2220_v16 }
  0x5e   :  { %332 = vmatprep.subr.bf16.mxu0 %v2224_v17  ;;  %429 = vmatprep.subr.bf16.mxu1 %v2224_v17 }
  0x61   :  { %333 = vmatpush1.bf16.msra.mxu0 %v2227_v18  ;;  %430 = vmatpush1.bf16.msra.mxu1 %v2227_v18 }
  0x62   :  { %334 = vmatprep.subr.bf16.mxu0 %v2229_v19  ;;  %431 = vmatprep.subr.bf16.mxu1 %v2229_v19 }
  0x65   :  { %335 = vmatpush1.bf16.msra.mxu0 %v2235_v20  ;;  %432 = vmatpush1.bf16.msra.mxu1 %v2235_v20 }
  0x66   :  { %336 = vmatprep.subr.bf16.mxu0 %v2240_v21  ;;  %433 = vmatprep.subr.bf16.mxu1 %v2240_v21 }
  0x69   :  { %337 = vmatpush1.bf16.msra.mxu0 %v2244_v22  ;;  %434 = vmatpush1.bf16.msra.mxu1 %v2244_v22 }
  0x6a   :  { %338 = vmatprep.subr.bf16.mxu0 %v2248_v23  ;;  %435 = vmatprep.subr.bf16.mxu1 %v2248_v23 }
  0x6d   :  { %339 = vmatpush1.bf16.msra.mxu0 %v2252_v24  ;;  %436 = vmatpush1.bf16.msra.mxu1 %v2252_v24 }
  0x6e   :  { %340 = vmatprep.subr.bf16.mxu0 %v2256_v25  ;;  %437 = vmatprep.subr.bf16.mxu1 %v2256_v25 }
  0x71   :  { %341 = vmatpush1.bf16.msra.mxu0 %v2260_v26  ;;  %438 = vmatpush1.bf16.msra.mxu1 %v2260_v26 }
  0x72   :  { %342 = vmatprep.subr.bf16.mxu0 %v2264_v27  ;;  %439 = vmatprep.subr.bf16.mxu1 %v2264_v27 }
  0x75   :  { %343 = vmatpush1.bf16.msra.mxu0 %v2268_v28  ;;  %440 = vmatpush1.bf16.msra.mxu1 %v2268_v28 }
  0x76   :  { %344 = vmatprep.subr.bf16.mxu0 %v2272_v29  ;;  %441 = vmatprep.subr.bf16.mxu1 %v2272_v29 }
  0x79   :  { %345 = vmatpush1.bf16.msra.mxu0 %v2276_v30  ;;  %442 = vmatpush1.bf16.msra.mxu1 %v2276_v30 }
  0x7a   :  { %346 = vmatprep.subr.bf16.mxu0 %v2280_v31  ;;  %443 = vmatprep.subr.bf16.mxu1 %v2280_v31 }
  0x7d   :  { %347 = vmatpush1.bf16.msra.mxu0 %v2284_v32  ;;  %444 = vmatpush1.bf16.msra.mxu1 %v2284_v32 }
  0x7e   :  { %348 = vmatprep.subr.bf16.mxu0 %v2288_v33  ;;  %445 = vmatprep.subr.bf16.mxu1 %v2288_v33 }
  0x81   :  { %349 = vmatpush1.bf16.msra.mxu0 %v2292_v34  ;;  %446 = vmatpush1.bf16.msra.mxu1 %v2292_v34 }
  0x82   :  { %608 = vmatprep.subr.bf16.mxu0 %v2159_v0 }
  0x84   :  { %351 = vmatmul.mubr.bf16.vlgmr.msra.gmra.mrb[0].mxu0 %v150_v39 }
  0x85   :  { %360 = vmatprep.mubr.bf16.mxu0 %v153_v40  ;;  %609 = vmatpush1.bf16.msra.mxu0 %v2161_v1 }
  0x86   :  { %610 = vmatprep.subr.bf16.mxu0 %v2164_v2 }
  0x89   :  { %611 = vmatpush1.bf16.msra.mxu0 %v2168_v3 }
  0x8a   :  { %612 = vmatprep.subr.bf16.mxu0 %v2172_v4 }
  0x8c   :  { %361 = vmatmul.mubr.bf16.gmra.mrb[4].mxu0 %v152_v45 }
  0x8d   :  { %370 = vmatprep.mubr.bf16.mxu0 %v155_v46  ;;  %613 = vmatpush1.bf16.msra.mxu0 %v2176_v5 }
  0x8e   :  { %614 = vmatprep.subr.bf16.mxu0 %v2180_v6 }
  0x91   :  { %615 = vmatpush1.bf16.msra.mxu0 %v2184_v7 }
  0x92   :  { %616 = vmatprep.subr.bf16.mxu0 %v2188_v8 }
  0x94   :  { %371 = vmatmul.mubr.bf16.gmra.mrb[8].mxu0 %v154_v51 }
  0x95   :  { %380 = vmatprep.mubr.bf16.mxu0 %v157_v52  ;;  %617 = vmatpush1.bf16.msra.mxu0 %v2192_v9 }
  0x96   :  { %618 = vmatprep.subr.bf16.mxu0 %v2196_v10 }
  0x99   :  { %619 = vmatpush1.bf16.msra.mxu0 %v2200_v11 }
  0x9a   :  { %620 = vmatprep.subr.bf16.mxu0 %v2204_v12 }
  0x9c   :  { %381 = vmatmul.mubr.bf16.gmra.mrb[12].mxu0 %v156_v55 }
  0x9d   :  { %621 = vmatpush1.bf16.msra.mxu0 %v2220_v16 }
  0x9e   :  { %622 = vmatprep.subr.bf16.mxu0 %v2224_v17 }
  0xa1   :  { %623 = vmatpush1.bf16.msra.mxu0 %v2227_v18 }
  0xa2   :  { %624 = vmatprep.subr.bf16.mxu0 %v2229_v19 }
  0xa5   :  { %625 = vmatpush1.bf16.msra.mxu0 %v2235_v20 }
  0xa6   :  { %626 = vmatprep.subr.bf16.mxu0 %v2240_v21 }
  0xa9   :  { %627 = vmatpush1.bf16.msra.mxu0 %v2244_v22 }
  0xaa   :  { %628 = vmatprep.subr.bf16.mxu0 %v2248_v23 }
  0xad   :  { %629 = vmatpush1.bf16.msra.mxu0 %v2252_v24 }
  0xae   :  { %630 = vmatprep.subr.bf16.mxu0 %v2256_v25 }
  0xb1   :  { %631 = vmatpush1.bf16.msra.mxu0 %v2260_v26 }
  0xb2   :  { %632 = vmatprep.subr.bf16.mxu0 %v2264_v27 }
  0xb5   :  { %633 = vmatpush1.bf16.msra.mxu0 %v2268_v28 }
  0xb6   :  { %634 = vmatprep.subr.bf16.mxu0 %v2272_v29 }
  0xb9   :  { %635 = vmatpush1.bf16.msra.mxu0 %v2276_v30 }
  0xba   :  { %636 = vmatprep.subr.bf16.mxu0 %v2280_v31 }
  0xbd   :  { %637 = vmatpush1.bf16.msra.mxu0 %v2284_v32 }
  0xbe   :  { %638 = vmatprep.subr.bf16.mxu0 %v2288_v33 }
  0xc1   :  { %639 = vmatpush1.bf16.msra.mxu0 %v2292_v34 }
 0x157   :  { %v2415_v56 = vpop.f32.mrb[0].mxu0 }
 0x158   :  { %v520_v57 = vmin.f32 %v2415_v56, 0.0  ;;  %v2418_v58 = vpop.f32.mrb[1].mxu0  ;;  %vm504_vm0 = vcmp.gt.f32.partialorder %v2415_v56, 0.0 }
 0x159   :  { %v521_v59 = vmin.f32 %v2418_v58, 0.0  ;;  %v2421_v60 = vpop.f32.mrb[2].mxu0  ;;  %vm505_vm1 = vcmp.gt.f32.partialorder %v2418_v58, 0.0 }
 0x15a   :  { %v536_v61 = vmul.f32 1.442695, %v520_v57  ;;  %v522_v62 = vmin.f32 %v2421_v60, 0.0  ;;  %v2424_v63 = vpop.f32.mrb[3].mxu0  ;;  %v407_v15 = vpack.c.bf16 %v2421_v60, %v2415_v56  ;;  %vm506_vm2 = vcmp.gt.f32.partialorder %v2421_v60, 0.0 }
 0x15b   :  { %v538_v39 = vmul.f32 1.442695, %v521_v59  ;;  %v523_v40 = vmin.f32 %v2424_v63, 0.0  ;;  %v408_v45 = vpack.c.bf16 %v2424_v63, %v2418_v58  ;;  %vm507_vm3 = vcmp.gt.f32.partialorder %v2424_v63, 0.0 }
 0x15c   :  { %1837 = vpow2.f32 %v536_v61  ;;  %v540_v46 = vmul.f32 1.442695, %v522_v62 }
 0x15d   :  { %1839 = vpow2.f32 %v538_v39  ;;  %v542_v51 = vmul.f32 1.442695, %v523_v40  ;;  %447 = vmatprep.mubr.bf16.mxu1 %v408_v45 }
 0x15e   :  { %1841 = vpow2.f32 %v540_v46  ;;  %448 = vmatmul.mubr.bf16.vlgmr.msra.gmra.mrb[0].mxu1 %v407_v15 }
 0x15f   :  { %1843 = vpow2.f32 %v542_v51  ;;  %v2431_v52 = vpop.f32.mrb[4].mxu0 }
 0x160   :  { %v524_v55 = vmin.f32 %v2431_v52, 0.0  ;;  %v2434_v57 = vpop.f32.mrb[5].mxu0  ;;  %vm508_vm4 = vcmp.gt.f32.partialorder %v2431_v52, 0.0 }
 0x161   :  { %v525_v59 = vmin.f32 %v2434_v57, 0.0  ;;  %v2437_v34 = vpop.f32.mrb[6].mxu0  ;;  %vm509_vm5 = vcmp.gt.f32.partialorder %v2434_v57, 0.0 }
 0x162   :  { %v544_v33 = vmul.f32 1.442695, %v524_v55  ;;  %v526_v61 = vmin.f32 %v2437_v34, 0.0  ;;  %v2440_v62 = vpop.f32.mrb[7].mxu0  ;;  %v409_v39 = vpack.c.bf16 %v2437_v34, %v2431_v52  ;;  %vm510_vm6 = vcmp.gt.f32.partialorder %v2437_v34, 0.0 }
 0x163   :  { %v546_v15 = vmul.f32 1.442695, %v525_v59  ;;  %v527_v40 = vmin.f32 %v2440_v62, 0.0  ;;  %v410_v45 = vpack.c.bf16 %v2440_v62, %v2434_v57  ;;  %vm511_vm7 = vcmp.gt.f32.partialorder %v2440_v62, 0.0 }
 0x164   :  { %1845 = vpow2.f32 %v544_v33  ;;  %v548_v46 = vmul.f32 1.442695, %v526_v61 }
 0x165   :  { %1847 = vpow2.f32 %v546_v15  ;;  %v550_v51 = vmul.f32 1.442695, %v527_v40  ;;  %457 = vmatprep.mubr.bf16.mxu1 %v410_v45 }
 0x166   :  { %v1838_v32 = vpop.eup %1837  ;;  %1849 = vpow2.f32 %v548_v46  ;;  %458 = vmatmul.mubr.bf16.gmra.mrb[4].mxu1 %v409_v39 }
 0x167   :  { %v1840_v55 = vpop.eup %1839  ;;  %1851 = vpow2.f32 %v550_v51  ;;  %v2447_v31 = vpop.f32.mrb[8].mxu0  ;;  %v1703_v45 = vadd.f32 -1.0, %v1838_v32 }
 0x168   :  { %v1842_v30 = vpop.eup %1841  ;;  %v528_v59 = vmin.f32 %v2447_v31, 0.0  ;;  %v2451_v29 = vpop.f32.mrb[9].mxu0  ;;  %v1704_v40 = vadd.f32 -1.0, %v1840_v55  ;;  %vm512_vm11 = vcmp.gt.f32.partialorder %v2447_v31, 0.0 }
 0x169   :  { %v1844_v33 = vpop.eup %1843  ;;  %v1705_v61 = vadd.f32 -1.0, %v1842_v30  ;;  %v529_v15 = vmin.f32 %v2451_v29, 0.0  ;;  %v2456_v39 = vpop.f32.mrb[10].mxu0  ;;  %vm513_vm9 = vcmp.gt.f32.partialorder %v2451_v29, 0.0 }
 0x16a   :  { %v552_v46 = vmul.f32 1.442695, %v528_v59  ;;  %v530_v51 = vmin.f32 %v2456_v39, 0.0  ;;  %v2459_v28 = vpop.f32.mrb[11].mxu0  ;;  %v411_v27 = vpack.c.bf16 %v2456_v39, %v2447_v31  ;;  %v1706_v24 = vadd.f32 -1.0, %v1844_v33 }
 0x16b   :  { %v554_v26 = vmul.f32 1.442695, %v529_v15  ;;  %v531_v25 = vmin.f32 %v2459_v28, 0.0  ;;  %v412_v30 = vpack.c.bf16 %v2459_v28, %v2451_v29  ;;  %v2470_v32 = vsel %vm506_vm2, %v2421_v60, %v1705_v61 }
 0x16c   :  { %1853 = vpow2.f32 %v552_v46  ;;  %v556_v23 = vmul.f32 1.442695, %v530_v51  ;;  %3229 = vst [vmem:[#allocation31_spill] sm:$0xff] %v2470_v32  ;;  %v2475_v59 = vsel %vm505_vm1, %v2418_v58, %v1704_v40  ;;  %v2478_v15 = vsel %vm507_vm3, %v2424_v63, %v1706_v24 }
 0x16d   :  { %1855 = vpow2.f32 %v554_v26  ;;  %v558_v55 = vmul.f32 1.442695, %v531_v25  ;;  %467 = vmatprep.mubr.bf16.mxu1 %v412_v30  ;;  %3230 = vst [vmem:[#allocation32_spill] sm:$0xff] %v2475_v59  ;;  %3231 = vst [vmem:[#allocation33_spill] sm:$0xff] %v2478_v15  ;;  %v707_v46 = vpack.c.bf16 %v2478_v15, %v2475_v59  ;;  %v2485_v26 = vsel %vm504_vm0, %v2415_v56, %v1703_v45 }
 0x16e   :  { %v1846_v33 = vpop.eup %1845  ;;  %1857 = vpow2.f32 %v556_v23  ;;  %468 = vmatmul.mubr.bf16.gmra.mrb[8].mxu1 %v411_v27  ;;  %3232 = vst [vmem:[#allocation34_spill] sm:$0xff] %v2485_v26  ;;  %v706_v40 = vpack.c.bf16 %v2470_v32, %v2485_v26  ;;  %vm514_vm8 = vcmp.gt.f32.partialorder %v2456_v39, 0.0  ;;  %vm515_vm10 = vcmp.gt.f32.partialorder %v2459_v28, 0.0 }
 0x16f   :  { %v1848_v25 = vpop.eup %1847  ;;  %1859 = vpow2.f32 %v558_v55  ;;  %v2487_v61 = vpop.f32.mrb[12].mxu0  ;;  %731 = vmatprep.subr.bf16.mxu1 %v707_v46  ;;  %v1707_v59 = vadd.f32 -1.0, %v1846_v33  ;;  %vm724_vm0 = vcmask 523264  }
 0x170   :  { %v1850_v24 = vpop.eup %1849  ;;  %v532_v23 = vmin.f32 %v2487_v61, 0.0  ;;  %v2493_v27 = vpop.f32.mrb[13].mxu0  ;;  %732 = vmatpush1.bf16.msra.mxu1 %v706_v40  ;;  %v1708_v15 = vadd.f32 -1.0, %v1848_v25  ;;  %vm516_vm15 = vcmp.gt.f32.partialorder %v2487_v61, 0.0 }
 0x171   :  { %v1852_v51 = vpop.eup %1851  ;;  %v1709_v45 = vadd.f32 -1.0, %v1850_v24  ;;  %v533_v30 = vmin.f32 %v2493_v27, 0.0  ;;  %v2498_v55 = vpop.f32.mrb[14].mxu0  ;;  %vm517_vm13 = vcmp.gt.f32.partialorder %v2493_v27, 0.0 }
 0x172   :  { %v560_v32 = vmul.f32 1.442695, %v532_v23  ;;  %v534_v26 = vmin.f32 %v2498_v55, 0.0  ;;  %v2501_v22 = vpop.f32.mrb[15].mxu0  ;;  %v413_v46 = vpack.c.bf16 %v2498_v55, %v2487_v61  ;;  %v1710_v19 = vadd.f32 -1.0, %v1852_v51 }
 0x173   :  { %v562_v21 = vmul.f32 1.442695, %v533_v30  ;;  %v535_v20 = vmin.f32 %v2501_v22, 0.0  ;;  %v414_v24 = vpack.c.bf16 %v2501_v22, %v2493_v27  ;;  %v2512_v33 = vsel %vm510_vm6, %v2437_v34, %v1709_v45 }
 0x174   :  { %1861 = vpow2.f32 %v560_v32  ;;  %v564_v40 = vmul.f32 1.442695, %v534_v26  ;;  %3233 = vst [vmem:[#allocation35_spill] sm:$0xff] %v2512_v33  ;;  %v2517_v23 = vsel %vm509_vm5, %v2434_v57, %v1708_v15  ;;  %v2520_v30 = vsel %vm511_vm7, %v2440_v62, %v1710_v19 }
 0x175   :  { %1863 = vpow2.f32 %v562_v21  ;;  %v566_v25 = vmul.f32 1.442695, %v535_v20  ;;  %477 = vmatprep.mubr.bf16.mxu1 %v414_v24  ;;  %3234 = vst [vmem:[#allocation36_spill] sm:$0xff] %v2520_v30  ;;  %v709_v26 = vpack.c.bf16 %v2520_v30, %v2517_v23  ;;  %v2527_v21 = vsel %vm508_vm4, %v2431_v52, %v1707_v59 }
 0x176   :  { %v1854_v32 = vpop.eup %1853  ;;  %1865 = vpow2.f32 %v564_v40  ;;  %478 = vmatmul.mubr.bf16.gmra.mrb[12].mxu1 %v413_v46  ;;  %3235 = vst [vmem:[#allocation37_spill] sm:$0xff] %v2527_v21  ;;  %v708_v15 = vpack.c.bf16 %v2512_v33, %v2527_v21  ;;  %vm518_vm12 = vcmp.gt.f32.partialorder %v2498_v55, 0.0  ;;  %vm519_vm14 = vcmp.gt.f32.partialorder %v2501_v22, 0.0 }
 0x177   :  { %v1856_v20 = vpop.eup %1855  ;;  %1867 = vpow2.f32 %v566_v25  ;;  %733 = vmatprep.subr.bf16.mxu1 %v709_v26  ;;  %v1711_v24 = vadd.f32 -1.0, %v1854_v32 }
 0x178   :  { %v1858_v51 = vpop.eup %1857  ;;  %v1712_v19 = vadd.f32 -1.0, %v1856_v20  ;;  %734 = vmatpush1.bf16.msra.mxu1 %v708_v15 }
 0x179   :  { %v1860_v45 = vpop.eup %1859  ;;  %v1713_v40 = vadd.f32 -1.0, %v1858_v51  ;;  %v2547_v20 = vsel %vm512_vm11, %v2447_v31, %v1711_v24 }
 0x17a   :  { %v1714_v46 = vadd.f32 -1.0, %v1860_v45  ;;  %v2539_v25 = vsel %vm513_vm9, %v2451_v29, %v1712_v19 }
 0x17b   :  { %v2535_v59 = vsel %vm514_vm8, %v2456_v39, %v1713_v40 }
 0x17c   :  { %3236 = vst [vmem:[#allocation38_spill] sm:$0xff] %v2535_v59  ;;  %v2542_v26 = vsel %vm515_vm10, %v2459_v28, %v1714_v46  ;;  %v710_v51 = vpack.c.bf16 %v2535_v59, %v2547_v20 }
 0x17d   :  { %v711_v32 = vpack.c.bf16 %v2542_v26, %v2539_v25 }
 0x17e   :  { %v1862_v15 = vpop.eup %1861 }
 0x17f   :  { %v1864_v45 = vpop.eup %1863  ;;  %735 = vmatprep.subr.bf16.mxu1 %v711_v32  ;;  %v1715_v21 = vadd.f32 -1.0, %v1862_v15 }
 0x180   :  { %v1866_v40 = vpop.eup %1865  ;;  %736 = vmatpush1.bf16.msra.mxu1 %v710_v51  ;;  %v1716_v33 = vadd.f32 -1.0, %v1864_v45 }
 0x181   :  { %v1868_v19 = vpop.eup %1867  ;;  %v1717_v30 = vadd.f32 -1.0, %v1866_v40  ;;  %v2567_v45 = vsel %vm516_vm15, %v2487_v61, %v1715_v21 }
 0x182   :  { %v1718_v46 = vadd.f32 -1.0, %v1868_v19  ;;  %v2559_v32 = vsel %vm517_vm13, %v2493_v27, %v1716_v33  ;;  %3240 = vst [vmem:[#allocation42_spill] sm:$0xff] %v2567_v45  ;;  %v392_v33 = vadd.f32 %v2418_v58, %v2210_v13  ;;  %v395_v13 = vadd.f32 %v2431_v52, %v2327_v41 }
 0x183   :  { %v2555_v24 = vsel %vm518_vm12, %v2498_v55, %v1717_v30  ;;  %3238 = vst [vmem:[#allocation40_spill] sm:$0xff] %v2559_v32  ;;  %v391_v30 = vadd.f32 %v2415_v56, %v2297_v35 }
 0x184   :  { %3237 = vst [vmem:[#allocation39_spill] sm:$0xff] %v2555_v24  ;;  %v2562_v51 = vsel %vm519_vm14, %v2501_v22, %v1718_v46  ;;  %v712_v40 = vpack.c.bf16 %v2555_v24, %v2567_v45 }
 0x185   :  { %3239 = vst [vmem:[#allocation41_spill] sm:$0xff] %v2562_v51  ;;  %v713_v15 = vpack.c.bf16 %v2562_v51, %v2559_v32  ;;  %v393_v51 = vadd.f32 %v2421_v60, %v2302_v36  ;;  %v396_v36 = vadd.f32 %v2434_v57, %v2309_v37  ;;  %v399_v37 = vadd.f32 %v2447_v31, %v2355_v47 }
 0x187   :  { %737 = vmatprep.subr.bf16.mxu1 %v713_v15  ;;  %v394_v15 = vadd.f32 %v2424_v63, %v2215_v14  ;;  %v397_v14 = vadd.f32 %v2437_v34, %v2332_v42  ;;  %v400_v34 = vadd.f32 %v2451_v29, %v2338_v43  ;;  %v403_v29 = vadd.f32 %v2487_v61, %v2383_v53 }
 0x188   :  { %738 = vmatpush1.bf16.msra.mxu1 %v712_v40 }
 0x231   :  { %v449_v19 = vpop.f32.mrb[0].mxu1 }
 0x232   :  { %v2575_v46 = vadd.f32 %v449_v19, %v391_v30  ;;  %v451_v59 = vpop.f32.mrb[1].mxu1 }
 0x233   :  { %v2579_v21 = vadd.f32 %v451_v59, %v392_v33  ;;  %v453_v32 = vpop.f32.mrb[2].mxu1 }
 0x234   :  { %v2583_v40 = vadd.f32 %v453_v32, %v393_v51  ;;  %v600_v24 = vpack.c.bf16 %v453_v32, %v449_v19  ;;  %v455_v35 = vpop.f32.mrb[3].mxu1 }
 0x235   :  { %v2585_v56 = vadd.f32 %v455_v35, %v394_v15  ;;  %v601_v45 = vpack.c.bf16 %v455_v35, %v451_v59  ;;  %v398_v59 = vadd.f32 %v2440_v62, %v2314_v38  ;;  %v401_v38 = vadd.f32 %v2456_v39, %v2360_v48 }
 0x236   :  { %v402_v15 = vadd.f32 %v2459_v28, %v2343_v44  ;;  %v404_v48 = vadd.f32 %v2493_v27, %v2366_v49  ;;  %v405_v28 = vadd.f32 %v2498_v55, %v2388_v54  ;;  %v3200_v49 = vmov 0   ;;  %v1829_v54 = vld [vmem:[%s3162_s4] sm:$0xff]   ;;  %v691_v27 = vld [vmem:[%s3163_s5 + $0x10] sm:$0xff]  ;;  %v690_v55 = vld [vmem:[%s3163_s5 + $0x8] sm:$0xff] }
 0x237   :  { %640 = vmatprep.mubr.bf16.mxu0 %v601_v45  ;;  %763 = vmatprep.mubr.bf16.mxu1 %v3200_v49 }
 0x238   :  { %641 = vmatmul.mubr.bf16.vlgmr.msra.gmra.mrb[16].mxu0 %v600_v24  ;;  %1779 = vset.pattern.permute.xlu0 %v3200_v49 }
 0x239   :  { %v459_v58 = vpop.f32.mrb[4].mxu1  ;;  %1780 = vset.pattern.permute.xlu1 %v3200_v49  ;;  %1721 = vmatmul.mubr.msk.bf16.vlgmr.msra.gmra.mrb[16].mxu1 %vm724_vm0, %v1829_v54 }
 0x23a   :  { %v2591_v60 = vadd.f32 %v459_v58, %v395_v13  ;;  %v461_v30 = vpop.f32.mrb[5].mxu1  ;;  %773 = vmatprep.mubr.bf16.mxu1 %v3200_v49  ;;  %865 = vperm.xlu1 %1780, %v691_v27  }
 0x23b   :  { %v2595_v63 = vadd.f32 %v461_v30, %v396_v36  ;;  %v463_v32 = vpop.f32.mrb[6].mxu1 }
 0x23c   :  { %v2599_v24 = vadd.f32 %v463_v32, %v397_v14  ;;  %v602_v51 = vpack.c.bf16 %v463_v32, %v459_v58  ;;  %v465_v41 = vpop.f32.mrb[7].mxu1  ;;  %v406_v14 = vadd.f32 %v2501_v22, %v2371_v50  ;;  %v1830_v22 = vld [vmem:[%s3162_s4 + $0x8] sm:$0xff]   ;;  %v689_v50 = vld [vmem:[%s3163_s5] sm:$0xff] }
 0x23d   :  { %v2601_v52 = vadd.f32 %v465_v41, %v398_v59  ;;  %v603_v45 = vpack.c.bf16 %v465_v41, %v461_v30  ;;  %855 = vperm.xlu0 %1779, %v689_v50   ;;  %v692_v41 = vld [vmem:[%s3163_s5 + $0x18] sm:$0xff] }
 0x23e   :  { %870 = vperm.xlu1 %1780, %v692_v41  }
 0x23f   :  { %650 = vmatprep.mubr.bf16.mxu0 %v603_v45  ;;  %v693_v45 = vld [vmem:[%s3164_s6] sm:$0xff] }
 0x240   :  { %651 = vmatmul.mubr.bf16.gmra.mrb[20].mxu0 %v602_v51 }
 0x241   :  { %v469_v57 = vpop.f32.mrb[8].mxu1  ;;  %1722 = vmatmul.mubr.msk.bf16.gmra.mrb[20].mxu1 %vm724_vm0, %v1830_v22  ;;  %860 = vperm.xlu0 %1779, %v690_v55  }
 0x242   :  { %v2607_v42 = vadd.f32 %v469_v57, %v399_v37  ;;  %v471_v19 = vpop.f32.mrb[9].mxu1  ;;  %832 = vmatprep.mubr.bf16.mxu1 %v3200_v49  ;;  %v694_v37 = vld [vmem:[%s3164_s6 + $0x8] sm:$0xff] }
 0x243   :  { %v2611_v62 = vadd.f32 %v471_v19, %v400_v34  ;;  %v473_v33 = vpop.f32.mrb[10].mxu1  ;;  %908 = vperm.xlu1 %1780, %v694_v37   ;;  %v696_v34 = vld [vmem:[%s3164_s6 + $0x18] sm:$0xff] }
 0x244   :  { %v2615_v35 = vadd.f32 %v473_v33, %v401_v38  ;;  %v604_v13 = vpack.c.bf16 %v473_v33, %v469_v57  ;;  %v475_v31 = vpop.f32.mrb[11].mxu1  ;;  %v695_v57 = vld [vmem:[%s3164_s6 + $0x10] sm:$0xff]  ;;  %v1248_v38 = vld [vmem:[%s3168_s10 + $0x8] sm:$0xff] }
 0x245   :  { %v2617_v47 = vadd.f32 %v475_v31, %v402_v15  ;;  %v605_v58 = vpack.c.bf16 %v475_v31, %v471_v19  ;;  %903 = vperm.xlu0 %1779, %v693_v45   ;;  %v1247_v19 = vld [vmem:[%s3168_s10] sm:$0xff]  ;;  %v1249_v33 = vld [vmem:[%s3168_s10 + $0x10] sm:$0xff]  ;;  %v1250_v15 = vld [vmem:[%s3168_s10 + $0x18] sm:$0xff]  ;;  %s2780_s10 = sld [smem:[#allocation2 + $0x1]] }
 0x246   :  { %v1252_v31 = vld [vmem:[%s3169_s11 + $0x8] sm:$0xff] }
 0x247   :  { %660 = vmatprep.mubr.bf16.mxu0 %v605_v58  ;;  %918 = vperm.xlu1 %1780, %v696_v34   ;;  %v1253_v58 = vld [vmem:[%s3169_s11 + $0x10] sm:$0xff] }
 0x248   :  { %661 = vmatmul.mubr.bf16.gmra.mrb[24].mxu0 %v604_v13  ;;  %v1251_v13 = vld [vmem:[%s3169_s11] sm:$0xff] }
 0x249   :  { %v479_v43 = vpop.f32.mrb[12].mxu1  ;;  %913 = vperm.xlu0 %1779, %v695_v57  }
 0x24a   :  { %v2623_v39 = vadd.f32 %v479_v43, %v403_v29  ;;  %v481_v36 = vpop.f32.mrb[13].mxu1  ;;  %v1254_v29 = vld [vmem:[%s3169_s11 + $0x18] sm:$0xff]  ;;  %s1669_s11 = sld [smem:[#allocation2 + $0x2]] }
 0x24b   :  { %v2627_v44 = vadd.f32 %v481_v36, %v404_v48  ;;  %v483_v30 = vpop.f32.mrb[14].mxu1  ;;  %1417 = vperm.xlu1 %1780, %v1248_v38  }
 0x24c   :  { %3241 = vst [vmem:[#allocation43_spill] sm:$0xff] %v2623_v39  ;;  %v2631_v32 = vadd.f32 %v483_v30, %v405_v28  ;;  %v606_v59 = vpack.c.bf16 %v483_v30, %v479_v43  ;;  %v485_v53 = vpop.f32.mrb[15].mxu1 }
 0x24d   :  { %v2633_v61 = vadd.f32 %v485_v53, %v406_v14  ;;  %v607_v51 = vpack.c.bf16 %v485_v53, %v481_v36  ;;  %1412 = vperm.xlu0 %1779, %v1247_v19  }
 0x24e   :  { %3242 = vst [vmem:[#allocation44_spill] sm:$0xff] %v2631_v32 }
 0x24f   :  { %670 = vmatprep.mubr.bf16.mxu0 %v607_v51  ;;  %1427 = vperm.xlu1 %1780, %v1250_v15  }
 0x250   :  { %671 = vmatmul.mubr.bf16.gmra.mrb[28].mxu0 %v606_v59 }
 0x251   :  { %1320 = vmatprep.mubr.bf16.mxu0 %v3200_v49  ;;  %1422 = vperm.xlu0 %1779, %v1249_v33  }
 0x253   :  { %1465 = vperm.xlu1 %1780, %v1252_v31   ;;  %v1831_v31 = vld [vmem:[#allocation7] sm:$0xff]  }
 0x255   :  { %1460 = vperm.xlu0 %1779, %v1251_v13  }
 0x257   :  { %1475 = vperm.xlu1 %1780, %v1254_v29  }
 0x259   :  { %1470 = vperm.xlu0 %1779, %v1253_v58   ;;  %v1832_v58 = vld [vmem:[#allocation7 + $0x8] sm:$0xff]  }
 0x2bc   :  { %v856_v29 = vpop.permute.xlu0 %855 }
 0x30b   :  { %v2697_v43 = vpop.f32.mrb[16].mxu0 }
 0x30c   :  { %v2699_v48 = vpop.f32.mrb[17].mxu0 }
 0x30d   :  { %v2701_v36 = vpop.f32.mrb[18].mxu0 }
 0x30e   :  { %v698_v28 = vpack.c.bf16 %v2701_v36, %v2697_v43  ;;  %v2705_v30 = vpop.f32.mrb[19].mxu0 }
 0x30f   :  { %v699_v14 = vpack.c.bf16 %v2705_v30, %v2699_v48 }
 0x311   :  { %800 = vmatprep.subr.bf16.mxu1 %v699_v14  ;;  %v866_v14 = vpop.permute.xlu1 %865 }
 0x312   :  { %801 = vmatpush1.bf16.msra.mxu1 %v698_v28 }
 0x313   :  { %v2709_v59 = vpop.f32.mrb[20].mxu0 }
 0x314   :  { %v2711_v53 = vpop.f32.mrb[21].mxu0 }
 0x315   :  { %v2713_v51 = vpop.f32.mrb[22].mxu0 }
 0x316   :  { %v700_v54 = vpack.c.bf16 %v2713_v51, %v2709_v59  ;;  %v2717_v22 = vpop.f32.mrb[23].mxu0 }
 0x317   :  { %v701_v50 = vpack.c.bf16 %v2717_v22, %v2711_v53 }
 0x319   :  { %802 = vmatprep.subr.bf16.mxu1 %v701_v50 }
 0x31a   :  { %803 = vmatpush1.bf16.msra.mxu1 %v700_v54 }
 0x31b   :  { %v2721_v27 = vpop.f32.mrb[24].mxu0 }
 0x31c   :  { %v2723_v55 = vpop.f32.mrb[25].mxu0 }
 0x31d   :  { %v2725_v41 = vpop.f32.mrb[26].mxu0 }
 0x31e   :  { %v702_v45 = vpack.c.bf16 %v2725_v41, %v2721_v27  ;;  %v2729_v37 = vpop.f32.mrb[27].mxu0 }
 0x31f   :  { %v703_v57 = vpack.c.bf16 %v2729_v37, %v2723_v55 }
 0x321   :  { %804 = vmatprep.subr.bf16.mxu1 %v703_v57 }
 0x322   :  { %805 = vmatpush1.bf16.msra.mxu1 %v702_v45  ;;  %v861_v45 = vpop.permute.xlu0 %860 }
 0x323   :  { %v2733_v34 = vpop.f32.mrb[28].mxu0 }
 0x324   :  { %v2735_v19 = vpop.f32.mrb[29].mxu0 }
 0x325   :  { %v2737_v38 = vpop.f32.mrb[30].mxu0 }
 0x326   :  { %v704_v33 = vpack.c.bf16 %v2737_v38, %v2733_v34  ;;  %v2741_v15 = vpop.f32.mrb[31].mxu0 }
 0x327   :  { %v705_v13 = vpack.c.bf16 %v2741_v15, %v2735_v19 }
 0x329   :  { %806 = vmatprep.subr.bf16.mxu1 %v705_v13 }
 0x32a   :  { %807 = vmatpush1.bf16.msra.mxu1 %v704_v33 }
 0x32b   :  { %1070 = vmatprep.subr.bf16.mxu1 %v2159_v0  ;;  %v3243_v0 = vld [vmem:[#allocation15_spill] sm:$0xff] }
 0x32d   :  { %1725 = vmatmul.mubr.msk.bf16.vlgmr.msra.gmra.mrb[16].mxu1 %vm724_vm0, %v1831_v31 }
 0x32e   :  { %842 = vmatprep.mubr.bf16.mxu1 %v3200_v49  ;;  %1071 = vmatpush1.bf16.msra.mxu1 %v2161_v1  ;;  %v3244_v1 = vld [vmem:[#allocation16_spill] sm:$0xff] }
 0x32f   :  { %1072 = vmatprep.subr.bf16.mxu1 %v2164_v2  ;;  %v3245_v2 = vld [vmem:[#allocation17_spill] sm:$0xff] }
 0x332   :  { %1073 = vmatpush1.bf16.msra.mxu1 %v2168_v3  ;;  %v3246_v3 = vld [vmem:[#allocation18_spill] sm:$0xff] }
 0x333   :  { %1074 = vmatprep.subr.bf16.mxu1 %v2172_v4  ;;  %v3247_v4 = vld [vmem:[#allocation19_spill] sm:$0xff] }
 0x335   :  { %1726 = vmatmul.mubr.msk.bf16.gmra.mrb[20].mxu1 %vm724_vm0, %v1832_v58 }
 0x336   :  { %1075 = vmatpush1.bf16.msra.mxu1 %v2176_v5  ;;  %v3248_v5 = vld [vmem:[#allocation20_spill] sm:$0xff] }
 0x337   :  { %1076 = vmatprep.subr.bf16.mxu1 %v2180_v6  ;;  %v3249_v6 = vld [vmem:[#allocation21_spill] sm:$0xff] }
 0x33a   :  { %1077 = vmatpush1.bf16.msra.mxu1 %v2184_v7  ;;  %v3250_v7 = vld [vmem:[#allocation22_spill] sm:$0xff] }
 0x33b   :  { %1078 = vmatprep.subr.bf16.mxu1 %v2188_v8  ;;  %v3251_v8 = vld [vmem:[#allocation23_spill] sm:$0xff] }
 0x33e   :  { %1079 = vmatpush1.bf16.msra.mxu1 %v2192_v9  ;;  %v3252_v9 = vld [vmem:[#allocation24_spill] sm:$0xff] }
 0x33f   :  { %1080 = vmatprep.subr.bf16.mxu1 %v2196_v10  ;;  %v3253_v10 = vld [vmem:[#allocation25_spill] sm:$0xff] }
 0x342   :  { %1081 = vmatpush1.bf16.msra.mxu1 %v2200_v11  ;;  %v3254_v11 = vld [vmem:[#allocation26_spill] sm:$0xff] }
 0x343   :  { %1082 = vmatprep.subr.bf16.mxu1 %v2204_v12  ;;  %v3255_v12 = vld [vmem:[#allocation27_spill] sm:$0xff] }
 0x346   :  { %1083 = vmatpush1.bf16.msra.mxu1 %v2220_v16  ;;  %v3256_v16 = vld [vmem:[#allocation28_spill] sm:$0xff] }
 0x347   :  { %1084 = vmatprep.subr.bf16.mxu1 %v2224_v17  ;;  %v3257_v17 = vld [vmem:[#allocation29_spill] sm:$0xff] }
 0x34a   :  { %1085 = vmatpush1.bf16.msra.mxu1 %v2227_v18  ;;  %v3258_v18 = vld [vmem:[#allocation30_spill] sm:$0xff] }
 0x34b   :  { %1086 = vmatprep.subr.bf16.mxu1 %v3243_v0 }
 0x34e   :  { %1087 = vmatpush1.bf16.msra.mxu1 %v3244_v1 }
 0x34f   :  { %1088 = vmatprep.subr.bf16.mxu1 %v3245_v2 }
 0x352   :  { %1089 = vmatpush1.bf16.msra.mxu1 %v3246_v3 }
 0x353   :  { %1090 = vmatprep.subr.bf16.mxu1 %v3247_v4 }
 0x356   :  { %1091 = vmatpush1.bf16.msra.mxu1 %v3248_v5  ;;  %v871_v5 = vpop.permute.xlu1 %870 }
 0x357   :  { %1092 = vmatprep.subr.bf16.mxu1 %v3249_v6 }
 0x35a   :  { %1093 = vmatpush1.bf16.msra.mxu1 %v3250_v7 }
 0x35b   :  { %1094 = vmatprep.subr.bf16.mxu1 %v3251_v8 }
 0x35e   :  { %1095 = vmatpush1.bf16.msra.mxu1 %v3252_v9 }
 0x35f   :  { %1096 = vmatprep.subr.bf16.mxu1 %v3253_v10 }
 0x362   :  { %1097 = vmatpush1.bf16.msra.mxu1 %v3254_v11 }
 0x363   :  { %1098 = vmatprep.subr.bf16.mxu1 %v3255_v12 }
 0x366   :  { %1099 = vmatpush1.bf16.msra.mxu1 %v3256_v16 }
 0x367   :  { %1100 = vmatprep.subr.bf16.mxu1 %v3257_v17 }
 0x36a   :  { %1101 = vmatpush1.bf16.msra.mxu1 %v3258_v18 }
 0x400   :  { %v834_v28 = vpop.f32.mrb[16].mxu1 }
 0x401   :  { %v873_v54 = vadd.f32 %v856_v29, %v834_v28  ;;  %v836_v50 = vpop.f32.mrb[17].mxu1 }
 0x402   :  { %v874_v57 = vadd.f32 %v856_v29, %v836_v50  ;;  %v838_v33 = vpop.f32.mrb[18].mxu1  ;;  %v904_v29 = vpop.permute.xlu0 %903 }
 0x403   :  { %v875_v13 = vadd.f32 %v861_v45, %v838_v33  ;;  %v840_v31 = vpop.f32.mrb[19].mxu1  ;;  %v881_v0 = vmax.f32 %v873_v54, 0.0 }
 0x404   :  { %v876_v58 = vadd.f32 %v861_v45, %v840_v31  ;;  %v882_v2 = vmax.f32 %v874_v57, 0.0  ;;  %v909_v57 = vpop.permute.xlu1 %908 }
 0x405   :  { %v883_v1 = vmax.f32 %v875_v13, 0.0 }
 0x406   :  { %v884_v3 = vmax.f32 %v876_v58, 0.0 }
 0x407   :  { %v889_v4 = vpack.c.bf16 %v883_v1, %v881_v0 }
 0x408   :  { %v890_v6 = vpack.c.bf16 %v884_v3, %v882_v2  ;;  %v844_v7 = vpop.f32.mrb[20].mxu1 }
 0x409   :  { %v877_v8 = vadd.f32 %v866_v14, %v844_v7  ;;  %v846_v9 = vpop.f32.mrb[21].mxu1  ;;  %v893_v12 = vunpack.c.l.bf16 %v889_v4  ;;  %v895_v16 = vunpack.c.h.bf16 %v889_v4  ;;  %v914_v4 = vpop.permute.xlu0 %913 }
 0x40a   :  { %v878_v10 = vadd.f32 %v866_v14, %v846_v9  ;;  %v848_v11 = vpop.f32.mrb[22].mxu1  ;;  %v894_v28 = vunpack.c.l.bf16 %v890_v6  ;;  %v896_v50 = vunpack.c.h.bf16 %v890_v6  ;;  %v919_v6 = vpop.permute.xlu1 %918 }
 0x40b   :  { %v879_v17 = vadd.f32 %v871_v5, %v848_v11  ;;  %v850_v18 = vpop.f32.mrb[23].mxu1  ;;  %v885_v54 = vmax.f32 %v877_v8, 0.0  ;;  %v921_v58 = vmul.f32 %v904_v29, %v893_v12  ;;  %v923_v0 = vmul.f32 %v909_v57, %v895_v16 }
 0x40c   :  { %v880_v45 = vadd.f32 %v871_v5, %v850_v18  ;;  %v886_v13 = vmax.f32 %v878_v10, 0.0  ;;  %v922_v2 = vmul.f32 %v904_v29, %v894_v28  ;;  %v924_v3 = vmul.f32 %v909_v57, %v896_v50  ;;  %v697_v57 = vld [vmem:[%s3165_s7] sm:$0x3] }
 0x40d   :  { %v887_v33 = vmax.f32 %v879_v17, 0.0  ;;  %v929_v32 = vadd.f32 %v923_v0, %v921_v58  ;;  %v953_v29 = vlaneseq }
 0x40e   :  { %v888_v31 = vmax.f32 %v880_v45, 0.0  ;;  %v938_v5 = vadd.f32 %v924_v3, %v922_v2 }
 0x40f   :  { %v891_v1 = vpack.c.bf16 %v887_v33, %v885_v54  ;;  %v2782_v33 = vshrl.u32 %v953_v29, 7 }
 0x410   :  { %v892_v14 = vpack.c.bf16 %v888_v31, %v886_v13  ;;  %v3203_v13 = vstv %s2780_s10 }
 0x411   :  { %v897_v7 = vunpack.c.l.bf16 %v891_v1  ;;  %v899_v9 = vunpack.c.h.bf16 %v891_v1  ;;  %v2791_v0 = vsub.s32 0, %v2782_v33  ;;  %v3202_v2 = vsub.s32 1, %v2782_v33 }
 0x412   :  { %v898_v11 = vunpack.c.l.bf16 %v892_v14  ;;  %v900_v49 = vunpack.c.h.bf16 %v892_v14  ;;  %v947_v14 = vstv %s1669_s11 }
 0x413   :  { %v925_v39 = vmul.f32 %v914_v4, %v897_v7  ;;  %v927_v10 = vmul.f32 %v919_v6, %v899_v9 }
 0x414   :  { %v926_v8 = vmul.f32 %v914_v4, %v898_v11  ;;  %v928_v16 = vmul.f32 %v919_v6, %v900_v49  ;;  %v951_v49 = vmul.f32 %v3203_v13, %v697_v57 }
 0x415   :  { %v930_v12 = vadd.f32 %v929_v32, %v925_v39 }
 0x416   :  { %v939_v17 = vadd.f32 %v938_v5, %v926_v8  ;;  %v956_v4 = vrot.slane %v951_v49, %v2791_v0  ;;  %v960_v6 = vrot.slane %v951_v49, %v3202_v2  ;;  %v2797_v8 = vstv %s98_s18 }
 0x417   :  { %v931_v18 = vadd.f32 %v930_v12, %v927_v10 }
 0x418   :  { %v940_v28 = vadd.f32 %v939_v17, %v928_v16 }
 0x419   :  { %v932_v50 = vrot.slane %v931_v18, 4 }
 0x41a   :  { %v941_v45 = vrot.slane %v940_v28, 4 }
 0x41b   :  { %v933_v54 = vadd.f32 %v932_v50, %v931_v18 }
 0x41c   :  { %v942_v31 = vadd.f32 %v941_v45, %v940_v28 }
 0x41d   :  { %v934_v58 = vrot.slane %v933_v54, 2 }
 0x41e   :  { %v943_v39 = vrot.slane %v942_v31, 2 }
 0x41f   :  { %v935_v32 = vadd.f32 %v934_v58, %v933_v54 }
 0x420   :  { %v944_v1 = vadd.f32 %v943_v39, %v942_v31 }
 0x421   :  { %v936_v3 = vrot.slane %v935_v32, 1 }
 0x422   :  { %v945_v7 = vrot.slane %v944_v1, 1 }
 0x423   :  { %v937_v9 = vadd.f32 %v936_v3, %v935_v32 }
 0x424   :  { %v946_v11 = vadd.f32 %v945_v7, %v944_v1 }
 0x425   :  { %v948_v5 = vadd.f32 %v947_v14, %v937_v9 }
 0x426   :  { %v949_v10 = vadd.f32 %v947_v14, %v946_v11 }
 0x427   :  { %v963_v12 = vadd.f32 %v956_v4, %v948_v5 }
 0x428   :  { %v964_v16 = vadd.f32 %v960_v6, %v949_v10 }
 0x429   :  { %v966_v17 = vmul.f32 %v2797_v8, %v963_v12 }
 0x42a   :  { %v967_v18 = vmul.f32 %v2797_v8, %v964_v16  ;;  %v3259_v16 = vld [vmem:[#allocation34_spill] sm:$0xff] }
 0x42b   :  { %v968_v29 = vsub.f32 0.0, %v966_v17 }
 0x42c   :  { %v969_v28 = vsub.f32 0.0, %v967_v18  ;;  %v3260_v18 = vld [vmem:[#allocation31_spill] sm:$0xff] }
 0x42d   :  { %v970_v50 = vmul.f32 1.442695, %v968_v29 }
 0x42e   :  { %v972_v45 = vmul.f32 1.442695, %v969_v28 }
 0x42f   :  { %1869 = vpow2.f32 %v970_v50  ;;  %v3262_v50 = vld [vmem:[#allocation33_spill] sm:$0xff] }
 0x430   :  { %1871 = vpow2.f32 %v972_v45 }
 0x439   :  { %v1870_v54 = vpop.eup %1869 }
 0x43a   :  { %v1872_v57 = vpop.eup %1871  ;;  %v974_v31 = vadd.f32 1.0, %v1870_v54 }
 0x43b   :  { %v975_v58 = vadd.f32 1.0, %v1872_v57 }
 0x43c   :  { %1873 = vrcp.f32 %v974_v31  ;;  %v3264_v31 = vld [vmem:[#allocation37_spill] sm:$0xff] }
 0x43d   :  { %1875 = vrcp.f32 %v975_v58 }
 0x446   :  { %v1874_v39 = vpop.eup %1873 }
 0x447   :  { %v1876_v32 = vpop.eup %1875  ;;  %v2802_v49 = vrot.slane %v1874_v39, %v2791_v0  ;;  %v1004_v1 = vsub.f32 1.0, %v1874_v39  ;;  %v3265_v39 = vld [vmem:[#allocation35_spill] sm:$0xff] }
 0x448   :  { %v987_v3 = vrot.slane %v1876_v32, %v2791_v0  ;;  %v1005_v14 = vsub.f32 1.0, %v1876_v32 }
 0x449   :  { %v2806_v7 = vrot.slane %v1004_v1, %v2791_v0  ;;  %v988_v9 = vmul.f32 %v2802_v49, %v2697_v43  ;;  %v990_v4 = vmul.f32 %v2802_v49, %v2701_v36  ;;  %v992_v11 = vmul.f32 %v2802_v49, %v2709_v59  ;;  %v3261_v59 = vld [vmem:[#allocation32_spill] sm:$0xff] }
 0x44a   :  { %v1013_v6 = vrot.slane %v1005_v14, %v2791_v0  ;;  %v989_v5 = vmul.f32 %v987_v3, %v2699_v48  ;;  %v991_v10 = vmul.f32 %v987_v3, %v2705_v30  ;;  %v993_v12 = vmul.f32 %v987_v3, %v2711_v53  ;;  %v3263_v30 = vld [vmem:[#allocation36_spill] sm:$0xff] }
 0x44b   :  { %v1014_v17 = vmul.f32 %v2806_v7, %v3259_v16  ;;  %v1016_v43 = vmul.f32 %v2806_v7, %v3260_v18  ;;  %v995_v29 = vmul.f32 %v987_v3, %v2717_v22  ;;  %v994_v36 = vmul.f32 %v2802_v49, %v2713_v51 }
 0x44c   :  { %v1015_v28 = vmul.f32 %v1013_v6, %v3261_v59  ;;  %v1017_v45 = vmul.f32 %v1013_v6, %v3262_v50  ;;  %v1019_v48 = vmul.f32 %v1013_v6, %v2517_v23  ;;  %v1021_v54 = vmul.f32 %v1013_v6, %v3263_v30  ;;  %v3271_v50 = vld [vmem:[#allocation40_spill] sm:$0xff] }
 0x44d   :  { %v1030_v53 = vadd.f32 %v1014_v17, %v988_v9  ;;  %v1032_v57 = vadd.f32 %v1016_v43, %v990_v4  ;;  %v1018_v58 = vmul.f32 %v2806_v7, %v3264_v31  ;;  %v1020_v32 = vmul.f32 %v2806_v7, %v3265_v39 }
 0x44e   :  { %v1031_v22 = vadd.f32 %v1015_v28, %v989_v5  ;;  %v1033_v1 = vadd.f32 %v1017_v45, %v991_v10  ;;  %v1035_v14 = vadd.f32 %v1019_v48, %v993_v12  ;;  %v1037_v51 = vadd.f32 %v1021_v54, %v995_v29  ;;  %v3272_v48 = vld [vmem:[#allocation41_spill] sm:$0xff] }
 0x44f   :  { %v2834_v16 = vadd.f32 %v1030_v53, %v2575_v46  ;;  %v2837_v18 = vadd.f32 %v1032_v57, %v2583_v40  ;;  %v1062_v23 = vpack.c.bf16 %v1032_v57, %v1030_v53  ;;  %v1034_v59 = vadd.f32 %v1018_v58, %v992_v11  ;;  %v3276_v58 = vld [vmem:[#allocation39_spill] sm:$0xff] }
 0x450   :  { %v2840_v9 = vadd.f32 %v1031_v22, %v2579_v21  ;;  %v2843_v4 = vadd.f32 %v1033_v1, %v2585_v56  ;;  %v1063_v17 = vpack.c.bf16 %v1033_v1, %v1031_v22  ;;  %v2846_v5 = vadd.f32 %v1035_v14, %v2595_v63 }
 0x451   :  { %v2849_v10 = vadd.f32 %v1037_v51, %v2601_v52  ;;  %v1065_v46 = vpack.c.bf16 %v1037_v51, %v1035_v14  ;;  %v1036_v12 = vadd.f32 %v1020_v32, %v994_v36  ;;  %v2852_v40 = vadd.f32 %v1034_v59, %v2591_v60  ;;  %v3280_v51 = vld [vmem:[#allocation44_spill] sm:$0xff] }
 0x452   :  { %3266 = vst [vmem:[#allocation15_spill] sm:$0xff] %v2840_v9  ;;  %3267 = vst [vmem:[#allocation16_spill] sm:$0xff] %v2843_v4  ;;  %1102 = vmatprep.mubr.bf16.mxu1 %v1063_v17  ;;  %v997_v11 = vmul.f32 %v987_v3, %v2723_v55  ;;  %v999_v21 = vmul.f32 %v987_v3, %v2729_v37  ;;  %v1023_v56 = vmul.f32 %v1013_v6, %v2539_v25  ;;  %v3270_v25 = vld [vmem:[#allocation38_spill] sm:$0xff] }
 0x453   :  { %3268 = vst [vmem:[#allocation17_spill] sm:$0xff] %v2846_v5  ;;  %3269 = vst [vmem:[#allocation18_spill] sm:$0xff] %v2849_v10  ;;  %v1025_v43 = vmul.f32 %v1013_v6, %v2542_v26  ;;  %1103 = vmatmul.mubr.bf16.vlgmr.msra.gmra.mrb[24].mxu1 %v1062_v23  ;;  %v2859_v63 = vadd.f32 %v1036_v12, %v2599_v24  ;;  %v1064_v52 = vpack.c.bf16 %v1036_v12, %v1034_v59 }
 0x454   :  { %v996_v29 = vmul.f32 %v2802_v49, %v2721_v27  ;;  %v998_v60 = vmul.f32 %v2802_v49, %v2725_v41  ;;  %1112 = vmatprep.mubr.bf16.mxu1 %v1065_v46  ;;  %v1039_v36 = vadd.f32 %v1023_v56, %v997_v11  ;;  %v1022_v37 = vmul.f32 %v2806_v7, %v2547_v20 }
 0x455   :  { %v1041_v55 = vadd.f32 %v1025_v43, %v999_v21  ;;  %v1024_v26 = vmul.f32 %v2806_v7, %v3270_v25  ;;  %v1001_v28 = vmul.f32 %v987_v3, %v2735_v19  ;;  %v1003_v24 = vmul.f32 %v987_v3, %v2741_v15 }
 0x456   :  { %v1027_v45 = vmul.f32 %v1013_v6, %v3271_v50  ;;  %v1029_v27 = vmul.f32 %v1013_v6, %v3272_v48  ;;  %v2874_v30 = vadd.f32 %v1039_v36, %v2611_v62  ;;  %v1038_v53 = vadd.f32 %v1022_v37, %v996_v29  ;;  %v3275_v6 = vld [vmem:[#allocation42_spill] sm:$0xff] }
 0x457   :  { %v2877_v41 = vadd.f32 %v1041_v55, %v2617_v47  ;;  %v1067_v54 = vpack.c.bf16 %v1041_v55, %v1039_v36  ;;  %v1040_v20 = vadd.f32 %v1024_v26, %v998_v60  ;;  %v1000_v19 = vmul.f32 %v2802_v49, %v2733_v34 }
 0x458   :  { %3273 = vst [vmem:[#allocation19_spill] sm:$0xff] %v2874_v30  ;;  %v1043_v57 = vadd.f32 %v1027_v45, %v1001_v28  ;;  %v1045_v31 = vadd.f32 %v1029_v27, %v1003_v24  ;;  %v2882_v15 = vadd.f32 %v1038_v53, %v2607_v42  ;;  %v1002_v3 = vmul.f32 %v2802_v49, %v2737_v38  ;;  %v3279_v38 = vld [vmem:[#allocation43_spill] sm:$0xff] }
 0x459   :  { %3274 = vst [vmem:[#allocation20_spill] sm:$0xff] %v2877_v41  ;;  %v1026_v62 = vmul.f32 %v2806_v7, %v3275_v6  ;;  %v1028_v47 = vmul.f32 %v2806_v7, %v3276_v58  ;;  %v2891_v39 = vadd.f32 %v1040_v20, %v2615_v35  ;;  %v1066_v32 = vpack.c.bf16 %v1040_v20, %v1038_v53 }
 0x45a   :  { %v2894_v22 = vadd.f32 %v1043_v57, %v2627_v44  ;;  %v2897_v34 = vadd.f32 %v1045_v31, %v2633_v61  ;;  %v1069_v42 = vpack.c.bf16 %v1045_v31, %v1043_v57 }
 0x45b   :  { %v1042_v1 = vadd.f32 %v1026_v62, %v1000_v19  ;;  %v1044_v14 = vadd.f32 %v1028_v47, %v1002_v3  ;;  %1113 = vmatmul.mubr.bf16.gmra.mrb[28].mxu1 %v1064_v52 }
 0x45c   :  { %3277 = vst [vmem:[#allocation21_spill] sm:$0xff] %v2894_v22  ;;  %3278 = vst [vmem:[#allocation22_spill] sm:$0xff] %v2897_v34  ;;  %1122 = vmatprep.mubr.bf16.mxu1 %v1067_v54 }
 0x45d   :  { %v2900_v49 = vadd.f32 %v1042_v1, %v3279_v38  ;;  %v2903_v7 = vadd.f32 %v1044_v14, %v3280_v51  ;;  %v1068_v35 = vpack.c.bf16 %v1044_v14, %v1042_v1 }
 0x463   :  { %1123 = vmatmul.mubr.bf16.gmra.mrb[32].mxu1 %v1066_v32 }
 0x464   :  { %1132 = vmatprep.mubr.bf16.mxu1 %v1069_v42 }
 0x46b   :  { %1133 = vmatmul.mubr.bf16.gmra.mrb[36].mxu1 %v1068_v35 }
 0x526   :  { %v2905_v44 = vpop.f32.mrb[24].mxu1 }
 0x527   :  { %v1159_v61 = vmin.f32 %v2905_v44, 0.0  ;;  %v2908_v23 = vpop.f32.mrb[25].mxu1  ;;  %vm1143_vm1 = vcmp.gt.f32.partialorder %v2905_v44, 0.0 }
 0x528   :  { %v1160_v59 = vmin.f32 %v2908_v23, 0.0  ;;  %v2911_v17 = vpop.f32.mrb[26].mxu1  ;;  %vm1144_vm2 = vcmp.gt.f32.partialorder %v2908_v23, 0.0 }
 0x529   :  { %v1175_v46 = vmul.f32 1.442695, %v1159_v61  ;;  %v1161_v12 = vmin.f32 %v2911_v17, 0.0  ;;  %v2914_v11 = vpop.f32.mrb[27].mxu1  ;;  %v1256_v21 = vpack.c.bf16 %v2911_v17, %v2905_v44  ;;  %vm1145_vm3 = vcmp.gt.f32.partialorder %v2911_v17, 0.0 }
 0x52a   :  { %v1177_v56 = vmul.f32 1.442695, %v1160_v59  ;;  %v1162_v43 = vmin.f32 %v2914_v11, 0.0  ;;  %v1257_v52 = vpack.c.bf16 %v2914_v11, %v2908_v23  ;;  %vm1146_vm4 = vcmp.gt.f32.partialorder %v2914_v11, 0.0 }
 0x52b   :  { %1877 = vpow2.f32 %v1175_v46  ;;  %v1179_v29 = vmul.f32 1.442695, %v1161_v12 }
 0x52c   :  { %1879 = vpow2.f32 %v1177_v56  ;;  %v1181_v60 = vmul.f32 1.442695, %v1162_v43 }
 0x52d   :  { %1881 = vpow2.f32 %v1179_v29 }
 0x52e   :  { %1883 = vpow2.f32 %v1181_v60  ;;  %v2921_v36 = vpop.f32.mrb[28].mxu1 }
 0x52f   :  { %v1163_v55 = vmin.f32 %v2921_v36, 0.0  ;;  %v2924_v37 = vpop.f32.mrb[29].mxu1  ;;  %vm1147_vm5 = vcmp.gt.f32.partialorder %v2921_v36, 0.0 }
 0x530   :  { %v1164_v25 = vmin.f32 %v2924_v37, 0.0  ;;  %v2927_v26 = vpop.f32.mrb[30].mxu1  ;;  %vm1148_vm6 = vcmp.gt.f32.partialorder %v2924_v37, 0.0 }
 0x531   :  { %v1183_v28 = vmul.f32 1.442695, %v1163_v55  ;;  %v1165_v24 = vmin.f32 %v2927_v26, 0.0  ;;  %v2930_v50 = vpop.f32.mrb[31].mxu1  ;;  %v1258_v45 = vpack.c.bf16 %v2927_v26, %v2921_v36  ;;  %vm1149_vm7 = vcmp.gt.f32.partialorder %v2927_v26, 0.0 }
 0x532   :  { %v1185_v48 = vmul.f32 1.442695, %v1164_v25  ;;  %v1166_v27 = vmin.f32 %v2930_v50, 0.0  ;;  %v1259_v54 = vpack.c.bf16 %v2930_v50, %v2924_v37  ;;  %vm1150_vm8 = vcmp.gt.f32.partialorder %v2930_v50, 0.0 }
 0x533   :  { %1885 = vpow2.f32 %v1183_v28  ;;  %v1187_v53 = vmul.f32 1.442695, %v1165_v24 }
 0x534   :  { %1887 = vpow2.f32 %v1185_v48  ;;  %v1189_v20 = vmul.f32 1.442695, %v1166_v27 }
 0x535   :  { %v1878_v57 = vpop.eup %1877  ;;  %1889 = vpow2.f32 %v1187_v53 }
 0x536   :  { %v1880_v31 = vpop.eup %1879  ;;  %1891 = vpow2.f32 %v1189_v20  ;;  %v2937_v19 = vpop.f32.mrb[32].mxu1  ;;  %v1727_v32 = vadd.f32 -1.0, %v1878_v57 }
 0x537   :  { %v1882_v3 = vpop.eup %1881  ;;  %v1167_v6 = vmin.f32 %v2937_v19, 0.0  ;;  %v2941_v62 = vpop.f32.mrb[33].mxu1  ;;  %v1728_v58 = vadd.f32 -1.0, %v1880_v31  ;;  %vm1151_vm12 = vcmp.gt.f32.partialorder %v2937_v19, 0.0 }
 0x538   :  { %v1884_v47 = vpop.eup %1883  ;;  %v1729_v42 = vadd.f32 -1.0, %v1882_v3  ;;  %v1168_v1 = vmin.f32 %v2941_v62, 0.0  ;;  %v2944_v14 = vpop.f32.mrb[34].mxu1  ;;  %v2967_v25 = vsel %vm1143_vm1, %v2905_v44, %v1727_v32  ;;  %vm1152_vm10 = vcmp.gt.f32.partialorder %v2941_v62, 0.0 }
 0x539   :  { %v1191_v38 = vmul.f32 1.442695, %v1167_v6  ;;  %v1169_v51 = vmin.f32 %v2944_v14, 0.0  ;;  %v2949_v35 = vpop.f32.mrb[35].mxu1  ;;  %v1730_v61 = vadd.f32 -1.0, %v1884_v47  ;;  %v2957_v43 = vsel %vm1144_vm2, %v2908_v23, %v1728_v58 }
 0x53a   :  { %v1193_v59 = vmul.f32 1.442695, %v1168_v1  ;;  %v1170_v46 = vmin.f32 %v2949_v35, 0.0  ;;  %v2954_v12 = vsel %vm1145_vm3, %v2911_v17, %v1729_v42  ;;  %3281 = vst [vmem:[#allocation23_spill] sm:$0xff] %v2957_v43  ;;  %vm1153_vm9 = vcmp.gt.f32.partialorder %v2944_v14, 0.0 }
 0x53b   :  { %1893 = vpow2.f32 %v1191_v38  ;;  %v1195_v56 = vmul.f32 1.442695, %v1169_v51  ;;  %v2960_v29 = vsel %vm1146_vm4, %v2914_v11, %v1730_v61  ;;  %v1264_v24 = vpack.c.bf16 %v2954_v12, %v2967_v25 }
 0x53c   :  { %3282 = vst [vmem:[#allocation24_spill] sm:$0xff] %v2960_v29  ;;  %1895 = vpow2.f32 %v1193_v59  ;;  %v1197_v60 = vmul.f32 1.442695, %v1170_v46  ;;  %v1265_v55 = vpack.c.bf16 %v2960_v29, %v2957_v43  ;;  %vm1154_vm11 = vcmp.gt.f32.partialorder %v2949_v35, 0.0 }
 0x53d   :  { %v1886_v28 = vpop.eup %1885  ;;  %1897 = vpow2.f32 %v1195_v56 }
 0x53e   :  { %v1888_v53 = vpop.eup %1887  ;;  %1899 = vpow2.f32 %v1197_v60  ;;  %v2975_v20 = vpop.f32.mrb[36].mxu1  ;;  %1288 = vmatprep.subr.bf16.mxu0 %v1265_v55  ;;  %v1731_v47 = vadd.f32 -1.0, %v1886_v28 }
 0x53f   :  { %v1890_v57 = vpop.eup %1889  ;;  %v1171_v31 = vmin.f32 %v2975_v20, 0.0  ;;  %v2979_v3 = vpop.f32.mrb[37].mxu1  ;;  %1289 = vmatpush1.bf16.msra.mxu0 %v1264_v24  ;;  %v1732_v6 = vadd.f32 -1.0, %v1888_v53  ;;  %vm1155_vm1 = vcmp.gt.f32.partialorder %v2975_v20, 0.0 }
 0x540   :  { %v1892_v58 = vpop.eup %1891  ;;  %v1733_v32 = vadd.f32 -1.0, %v1890_v57  ;;  %v1172_v42 = vmin.f32 %v2979_v3, 0.0  ;;  %v2982_v1 = vpop.f32.mrb[38].mxu1  ;;  %vm1156_vm15 = vcmp.gt.f32.partialorder %v2979_v3, 0.0 }
 0x541   :  { %v1199_v38 = vmul.f32 1.442695, %v1171_v31  ;;  %v1173_v51 = vmin.f32 %v2982_v1, 0.0  ;;  %v2987_v61 = vpop.f32.mrb[39].mxu1  ;;  %v1734_v59 = vadd.f32 -1.0, %v1892_v58  ;;  %v2992_v60 = vsel %vm1148_vm6, %v2924_v37, %v1732_v6 }
 0x542   :  { %3283 = vst [vmem:[#allocation25_spill] sm:$0xff] %v2987_v61  ;;  %v1201_v46 = vmul.f32 1.442695, %v1172_v42  ;;  %v1174_v56 = vmin.f32 %v2987_v61, 0.0  ;;  %3284 = vst [vmem:[#allocation26_spill] sm:$0xff] %v2992_v60  ;;  %v2998_v24 = vsel %vm1149_vm7, %v2927_v26, %v1733_v32  ;;  %v3005_v31 = vsel %vm1147_vm5, %v2921_v36, %v1731_v47 }
 0x543   :  { %1901 = vpow2.f32 %v1199_v38  ;;  %v1203_v55 = vmul.f32 1.442695, %v1173_v51  ;;  %v2995_v28 = vsel %vm1150_vm8, %v2930_v50, %v1734_v59  ;;  %v1266_v58 = vpack.c.bf16 %v2998_v24, %v3005_v31 }
 0x544   :  { %3285 = vst [vmem:[#allocation27_spill] sm:$0xff] %v2995_v28  ;;  %1903 = vpow2.f32 %v1201_v46  ;;  %v1205_v53 = vmul.f32 1.442695, %v1174_v56  ;;  %v1267_v57 = vpack.c.bf16 %v2995_v28, %v2992_v60  ;;  %v1263_v42 = vpack.c.bf16 %v2987_v61, %v2979_v3 }
 0x545   :  { %v1894_v6 = vpop.eup %1893  ;;  %1905 = vpow2.f32 %v1203_v55  ;;  %v1262_v32 = vpack.c.bf16 %v2982_v1, %v2975_v20  ;;  %vm1157_vm13 = vcmp.gt.f32.partialorder %v2982_v1, 0.0  ;;  %vm1158_vm14 = vcmp.gt.f32.partialorder %v2987_v61, 0.0 }
 0x546   :  { %v1896_v38 = vpop.eup %1895  ;;  %1907 = vpow2.f32 %v1205_v53  ;;  %1290 = vmatprep.subr.bf16.mxu0 %v1267_v57  ;;  %v1735_v47 = vadd.f32 -1.0, %v1894_v6 }
 0x547   :  { %v1898_v51 = vpop.eup %1897  ;;  %1291 = vmatpush1.bf16.msra.mxu0 %v1266_v58  ;;  %v1736_v59 = vadd.f32 -1.0, %v1896_v38 }
 0x548   :  { %v1900_v46 = vpop.eup %1899  ;;  %v1737_v56 = vadd.f32 -1.0, %v1898_v51  ;;  %v3029_v58 = vsel %vm1151_vm12, %v2937_v19, %v1735_v47 }
 0x549   :  { %v1738_v55 = vadd.f32 -1.0, %v1900_v46  ;;  %v3021_v53 = vsel %vm1152_vm10, %v2941_v62, %v1736_v59 }
 0x54a   :  { %v3017_v2 = vsel %vm1153_vm9, %v2944_v14, %v1737_v56  ;;  %3286 = vst [vmem:[#allocation28_spill] sm:$0xff] %v3021_v53 }
 0x54b   :  { %v3024_v57 = vsel %vm1154_vm11, %v2949_v35, %v1738_v55  ;;  %v1268_v51 = vpack.c.bf16 %v3017_v2, %v3029_v58 }
 0x54c   :  { %3287 = vst [vmem:[#allocation29_spill] sm:$0xff] %v3024_v57  ;;  %v1269_v6 = vpack.c.bf16 %v3024_v57, %v3021_v53 }
 0x54d   :  { %v1902_v38 = vpop.eup %1901 }
 0x54e   :  { %v1904_v46 = vpop.eup %1903  ;;  %1292 = vmatprep.subr.bf16.mxu0 %v1269_v6  ;;  %v1739_v27 = vadd.f32 -1.0, %v1902_v38 }
 0x54f   :  { %v1906_v56 = vpop.eup %1905  ;;  %1293 = vmatpush1.bf16.msra.mxu0 %v1268_v51  ;;  %v1740_v13 = vadd.f32 -1.0, %v1904_v46 }
 0x550   :  { %v1908_v59 = vpop.eup %1907  ;;  %v1741_v48 = vadd.f32 -1.0, %v1906_v56  ;;  %v3049_v46 = vsel %vm1155_vm1, %v2975_v20, %v1739_v27  ;;  %v1834_v27 = vld [vmem:[#allocation9 + $0x8] sm:$0xff]  }
 0x551   :  { %v1742_v55 = vadd.f32 -1.0, %v1908_v59  ;;  %v3041_v6 = vsel %vm1156_vm15, %v2979_v3, %v1740_v13  ;;  %v3290_v13 = vmov 0   ;;  %v1413_v59 = vpop.permute.xlu0 %1412 }
 0x552   :  { %v3037_v47 = vsel %vm1157_vm13, %v2982_v1, %v1741_v48  ;;  %3288 = vst [vmem:[#allocation30_spill] sm:$0xff] %v3041_v6  ;;  %v1833_v48 = vld [vmem:[#allocation9] sm:$0xff]  }
 0x553   :  { %v3044_v51 = vsel %vm1158_vm14, %v2987_v61, %v1742_v55  ;;  %v1270_v56 = vpack.c.bf16 %v3037_v47, %v3049_v46 }
 0x554   :  { %3289 = vst [vmem:[#allocation34_spill] sm:$0xff] %v3044_v51  ;;  %v1271_v38 = vpack.c.bf16 %v3044_v51, %v3041_v6 }
 0x555   :  { %v1423_v22 = vpop.permute.xlu0 %1422 }
 0x556   :  { %1294 = vmatprep.subr.bf16.mxu0 %v1271_v38 }
 0x557   :  { %1295 = vmatpush1.bf16.msra.mxu0 %v1270_v56 }
 0x558   :  { %1357 = vmatprep.subr.bf16.mxu0 %v1257_v52  ;;  %v3291_v52 = vpack.c.bf16 %v2949_v35, %v2941_v62 }
 0x55a   :  { %1745 = vmatmul.mubr.msk.bf16.vlgmr.msra.gmra.mrb[32].mxu0 %vm724_vm0, %v1833_v48 }
 0x55b   :  { %1358 = vmatpush1.bf16.msra.mxu0 %v1256_v21  ;;  %1330 = vmatprep.mubr.bf16.mxu0 %v3290_v13  ;;  %v3292_v21 = vpack.c.bf16 %v2944_v14, %v2937_v19 }
 0x55c   :  { %1359 = vmatprep.subr.bf16.mxu0 %v1259_v54  ;;  %v1835_v54 = vld [vmem:[%s3166_s8] sm:$0xff]  }
 0x55f   :  { %1360 = vmatpush1.bf16.msra.mxu0 %v1258_v45  ;;  %v1836_v45 = vld [vmem:[%s3166_s8 + $0x8] sm:$0xff]   ;;  %s1670_s8 = sld [smem:[#allocation2 + $0x3]] }
 0x560   :  { %1361 = vmatprep.subr.bf16.mxu0 %v3291_v52 }
 0x562   :  { %1746 = vmatmul.mubr.msk.bf16.gmra.mrb[36].mxu0 %vm724_vm0, %v1834_v27 }
 0x563   :  { %1362 = vmatpush1.bf16.msra.mxu0 %v3292_v21  ;;  %1389 = vmatprep.mubr.bf16.mxu0 %v3290_v13 }
 0x564   :  { %1363 = vmatprep.subr.bf16.mxu0 %v1263_v42  ;;  %v1418_v42 = vpop.permute.xlu1 %1417 }
 0x567   :  { %1364 = vmatpush1.bf16.msra.mxu0 %v1262_v32 }
 0x568   :  { %v1428_v10 = vpop.permute.xlu1 %1427 }
 0x56a   :  { %1749 = vmatmul.mubr.msk.bf16.vlgmr.msra.gmra.mrb[32].mxu0 %vm724_vm0, %v1835_v54 }
 0x56b   :  { %1399 = vmatprep.mubr.bf16.mxu0 %v3290_v13 }
 0x572   :  { %1750 = vmatmul.mubr.msk.bf16.gmra.mrb[36].mxu0 %vm724_vm0, %v1836_v45 }
 0x63d   :  { %v1391_v55 = vpop.f32.mrb[32].mxu0 }
 0x63e   :  { %v1430_v38 = vadd.f32 %v1413_v59, %v1391_v55  ;;  %v1393_v56 = vpop.f32.mrb[33].mxu0 }
 0x63f   :  { %v1431_v48 = vadd.f32 %v1413_v59, %v1393_v56  ;;  %v1395_v27 = vpop.f32.mrb[34].mxu0 }
 0x640   :  { %v1432_v52 = vadd.f32 %v1418_v42, %v1395_v27  ;;  %v1397_v21 = vpop.f32.mrb[35].mxu0  ;;  %v1438_v34 = vmax.f32 %v1430_v38, 0.0  ;;  %v1461_v27 = vpop.permute.xlu0 %1460 }
 0x641   :  { %v1433_v32 = vadd.f32 %v1418_v42, %v1397_v21  ;;  %v1439_v13 = vmax.f32 %v1431_v48, 0.0  ;;  %v1466_v48 = vpop.permute.xlu1 %1465 }
 0x642   :  { %v1440_v54 = vmax.f32 %v1432_v52, 0.0 }
 0x643   :  { %v1441_v41 = vmax.f32 %v1433_v32, 0.0 }
 0x644   :  { %v1446_v30 = vpack.c.bf16 %v1440_v54, %v1438_v34 }
 0x645   :  { %v1447_v5 = vpack.c.bf16 %v1441_v41, %v1439_v13  ;;  %v1401_v4 = vpop.f32.mrb[36].mxu0 }
 0x646   :  { %v1434_v45 = vadd.f32 %v1423_v22, %v1401_v4  ;;  %v1403_v9 = vpop.f32.mrb[37].mxu0  ;;  %v1450_v6 = vunpack.c.l.bf16 %v1446_v30  ;;  %v1452_v57 = vunpack.c.h.bf16 %v1446_v30  ;;  %v1471_v30 = vpop.permute.xlu0 %1470 }
 0x647   :  { %v1435_v51 = vadd.f32 %v1423_v22, %v1403_v9  ;;  %v1405_v55 = vpop.f32.mrb[38].mxu0  ;;  %v1451_v53 = vunpack.c.l.bf16 %v1447_v5  ;;  %v1453_v42 = vunpack.c.h.bf16 %v1447_v5  ;;  %v1476_v5 = vpop.permute.xlu1 %1475 }
 0x648   :  { %v1436_v59 = vadd.f32 %v1428_v10, %v1405_v55  ;;  %v1407_v56 = vpop.f32.mrb[39].mxu0  ;;  %v1442_v52 = vmax.f32 %v1434_v45, 0.0  ;;  %v1478_v54 = vmul.f32 %v1461_v27, %v1450_v6  ;;  %v1480_v41 = vmul.f32 %v1466_v48, %v1452_v57 }
 0x649   :  { %v1437_v38 = vadd.f32 %v1428_v10, %v1407_v56  ;;  %v1443_v32 = vmax.f32 %v1435_v51, 0.0  ;;  %v1479_v4 = vmul.f32 %v1461_v27, %v1451_v53  ;;  %v1481_v28 = vmul.f32 %v1466_v48, %v1453_v42 }
 0x64a   :  { %v1444_v21 = vmax.f32 %v1436_v59, 0.0  ;;  %v1486_v43 = vadd.f32 %v1480_v41, %v1478_v54 }
 0x64b   :  { %v1445_v34 = vmax.f32 %v1437_v38, 0.0  ;;  %v1495_v10 = vadd.f32 %v1481_v28, %v1479_v4 }
 0x64c   :  { %v1448_v13 = vpack.c.bf16 %v1444_v21, %v1442_v52  ;;  %v1255_v52 = vld [vmem:[%s3170_s12] sm:$0x3]  ;;  %s2032_s12 = smov [#allocation10]  }
 0x64d   :  { %v1449_v9 = vpack.c.bf16 %v1445_v34, %v1443_v32  ;;  %v3293_v34 = vstv %s2780_s10  ;;  %s1654_s28 = sshll.u32 %s2032_s12, 4  ;;  %s1655_s28 = int_to_ptr.vmem [resolvable:$true] %s1654_s28 }
 0x64e   :  { %v1454_v22 = vunpack.c.l.bf16 %v1448_v13  ;;  %v1456_v60 = vunpack.c.h.bf16 %v1448_v13  ;;  %v1507_v54 = vmul.f32 %v1255_v52, %v3293_v34  ;;  %s1993_s5 = scalar_lea.vmem %s1655_s28, 2048  ;;  %p1998_p0 = scmp.lt.s32.totalorder %s1655_s28, %s1655_s28 }
 0x64f   :  { %v1455_v55 = vunpack.c.l.bf16 %v1449_v9  ;;  %v1457_v29 = vunpack.c.h.bf16 %v1449_v9  ;;  %v3294_v9 = vsub.s32 1, %v2782_v33  ;;  %p1994_p13 = scmp.ne.s32.totalorder %s1655_s28, %s1993_s5  ;;  %p1999_p1 = scmp.lt.s32.totalorder %s1993_s5, %s1993_s5 }
 0x650   :  { %v1482_v61 = vmul.f32 %v1471_v30, %v1454_v22  ;;  %v1484_v59 = vmul.f32 %v1476_v5, %v1456_v60  ;;  %v1512_v13 = vrot.slane %v1507_v54, %v2791_v0 }
 0x651   :  { %v1483_v45 = vmul.f32 %v1471_v30, %v1455_v55  ;;  %v1485_v56 = vmul.f32 %v1476_v5, %v1457_v29  ;;  %v1504_v29 = vstv %s1670_s8  ;;  %v1516_v22 = vrot.slane %v1507_v54, %v3294_v9  ;;  %p2000_p2 = por %p1999_p1, %p1998_p0 }
 0x652   :  { %v1487_v51 = vadd.f32 %v1486_v43, %v1482_v61 }
 0x653   :  { %v1496_v6 = vadd.f32 %v1495_v10, %v1483_v45  ;;  %p2001_p3 = pnand %p2000_p2, %p1994_p13 }
 0x654   :  { %v1488_v57 = vadd.f32 %v1487_v51, %v1484_v59 }
 0x655   :  { %v1497_v38 = vadd.f32 %v1496_v6, %v1485_v56 }
 0x656   :  { %v1489_v53 = vrot.slane %v1488_v57, 4 }
 0x657   :  { %v1498_v27 = vrot.slane %v1497_v38, 4 }
 0x658   :  { %v1490_v42 = vadd.f32 %v1489_v53, %v1488_v57 }
 0x659   :  { %v1499_v21 = vadd.f32 %v1498_v27, %v1497_v38 }
 0x65a   :  { %v1491_v48 = vrot.slane %v1490_v42, 2 }
 0x65b   :  { %v1500_v32 = vrot.slane %v1499_v21, 2 }
 0x65c   :  { %v1492_v28 = vadd.f32 %v1491_v48, %v1490_v42 }
 0x65d   :  { %v1501_v60 = vadd.f32 %v1500_v32, %v1499_v21 }
 0x65e   :  { %v1493_v43 = vrot.slane %v1492_v28, 1 }
 0x65f   :  { %v1502_v61 = vrot.slane %v1501_v60, 1 }
 0x660   :  { %v1494_v41 = vadd.f32 %v1493_v43, %v1492_v28 }
 0x661   :  { %v1503_v4 = vadd.f32 %v1502_v61, %v1501_v60 }
 0x662   :  { %v1505_v30 = vadd.f32 %v1504_v29, %v1494_v41 }
 0x663   :  { %v1506_v55 = vadd.f32 %v1504_v29, %v1503_v4 }
 0x664   :  { %v1519_v5 = vadd.f32 %v1512_v13, %v1505_v30 }
 0x665   :  { %v1520_v10 = vadd.f32 %v1516_v22, %v1506_v55 }
 0x666   :  { %v1521_v45 = vmul.f32 %v1519_v5, %v2797_v8 }
 0x667   :  { %v1522_v59 = vmul.f32 %v1520_v10, %v2797_v8 }
 0x668   :  { %v1523_v51 = vsub.f32 0.0, %v1521_v45 }
 0x669   :  { %v1524_v56 = vsub.f32 0.0, %v1522_v59 }
 0x66a   :  { %v1525_v6 = vmul.f32 1.442695, %v1523_v51 }
 0x66b   :  { %v1527_v57 = vmul.f32 1.442695, %v1524_v56 }
 0x66c   :  { %1909 = vpow2.f32 %v1525_v6  ;;  %v3295_v6 = vld [vmem:[#allocation25_spill] sm:$0xff] }
 0x66d   :  { %1911 = vpow2.f32 %v1527_v57 }
 0x676   :  { %v1910_v38 = vpop.eup %1909 }
 0x677   :  { %v1912_v53 = vpop.eup %1911  ;;  %v1529_v27 = vadd.f32 1.0, %v1910_v38 }
 0x678   :  { %v1530_v42 = vadd.f32 1.0, %v1912_v53 }
 0x679   :  { %1913 = vrcp.f32 %v1529_v27  ;;  %v3298_v27 = vld [vmem:[#allocation26_spill] sm:$0xff] }
 0x67a   :  { %1915 = vrcp.f32 %v1530_v42 }
 0x683   :  { %v1914_v33 = vpop.eup %1913 }
 0x684   :  { %v1916_v52 = vpop.eup %1915  ;;  %v1538_v21 = vrot.slane %v1914_v33, %v2791_v0  ;;  %v1559_v48 = vsub.f32 1.0, %v1914_v33  ;;  %v3299_v33 = vld [vmem:[#allocation27_spill] sm:$0xff] }
 0x685   :  { %v1542_v32 = vrot.slane %v1916_v52, %v2791_v0  ;;  %v1560_v8 = vsub.f32 1.0, %v1916_v52 }
 0x686   :  { %v1543_v28 = vmul.f32 %v1538_v21, %v2905_v44  ;;  %v1545_v34 = vmul.f32 %v1538_v21, %v2911_v17  ;;  %v1547_v54 = vmul.f32 %v1538_v21, %v2921_v36  ;;  %v1549_v60 = vmul.f32 %v1538_v21, %v2927_v26 }
 0x687   :  { %v1551_v43 = vmul.f32 %v1538_v21, %v2937_v19  ;;  %v1553_v29 = vmul.f32 %v1538_v21, %v2944_v14  ;;  %v1555_v61 = vmul.f32 %v1538_v21, %v2975_v20  ;;  %v1557_v41 = vmul.f32 %v1538_v21, %v2982_v1  ;;  %v3300_v21 = vld [vmem:[#allocation28_spill] sm:$0xff] }
 0x688   :  { %v1564_v13 = vrot.slane %v1559_v48, %v2791_v0  ;;  %v1544_v4 = vmul.f32 %v1542_v32, %v2908_v23  ;;  %v1546_v44 = vmul.f32 %v1542_v32, %v2914_v11  ;;  %v1548_v17 = vmul.f32 %v1542_v32, %v2924_v37  ;;  %v3301_v48 = vld [vmem:[#allocation29_spill] sm:$0xff] }
 0x689   :  { %v1550_v36 = vmul.f32 %v1542_v32, %v2930_v50  ;;  %v1552_v26 = vmul.f32 %v1542_v32, %v2941_v62  ;;  %v1554_v19 = vmul.f32 %v1542_v32, %v2949_v35  ;;  %v1556_v14 = vmul.f32 %v1542_v32, %v2979_v3 }
 0x68a   :  { %v1569_v20 = vmul.f32 %v1564_v13, %v2967_v25  ;;  %v1571_v1 = vmul.f32 %v1564_v13, %v2954_v12  ;;  %v1573_v9 = vmul.f32 %v1564_v13, %v3005_v31  ;;  %v1575_v23 = vmul.f32 %v1564_v13, %v2998_v24 }
 0x68b   :  { %v1577_v11 = vmul.f32 %v1564_v13, %v3029_v58  ;;  %v1579_v37 = vmul.f32 %v1564_v13, %v3017_v2  ;;  %v1581_v50 = vmul.f32 %v1564_v13, %v3049_v46  ;;  %v1583_v62 = vmul.f32 %v1564_v13, %v3037_v47 }
 0x68c   :  { %v1585_v22 = vadd.f32 %v1569_v20, %v1543_v28  ;;  %v1587_v35 = vadd.f32 %v1571_v1, %v1545_v34  ;;  %v1589_v30 = vadd.f32 %v1573_v9, %v1547_v54  ;;  %v1591_v3 = vadd.f32 %v1575_v23, %v1549_v60  ;;  %v3303_v34 = vld [vmem:[#allocation34_spill] sm:$0xff]  ;;  %v3304_v9 = vld [vmem:[#allocation15_spill] sm:$0xff] }
 0x68d   :  { %v1593_v55 = vadd.f32 %v1577_v11, %v1551_v43  ;;  %v1595_v25 = vadd.f32 %v1579_v37, %v1553_v29  ;;  %v1597_v5 = vadd.f32 %v1581_v50, %v1555_v61  ;;  %v1599_v12 = vadd.f32 %v1583_v62, %v1557_v41  ;;  %v3305_v11 = vld [vmem:[#allocation16_spill] sm:$0xff]  ;;  %v3306_v50 = vld [vmem:[#allocation17_spill] sm:$0xff] }
 0x68e   :  { %v1601_v31 = vadd.f32 %v1585_v22, %v2834_v16  ;;  %v1603_v24 = vadd.f32 %v1587_v35, %v2837_v18  ;;  %v1605_v58 = vadd.f32 %v1589_v30, %v2852_v40  ;;  %v1607_v2 = vadd.f32 %v1591_v3, %v2859_v63  ;;  %v3307_v22 = vld [vmem:[#allocation18_spill] sm:$0xff]  ;;  %v3308_v30 = vld [vmem:[#allocation19_spill] sm:$0xff] }
 0x68f   :  { %v1609_v46 = vadd.f32 %v1593_v55, %v2882_v15  ;;  %v1611_v47 = vadd.f32 %v1595_v25, %v2891_v39  ;;  %v1613_v10 = vadd.f32 %v1597_v5, %v2900_v49  ;;  %v1615_v45 = vadd.f32 %v1599_v12, %v2903_v7  ;;  %v3296_v15 = vld [vmem:[#allocation23_spill] sm:$0xff]  ;;  %v3297_v49 = vld [vmem:[#allocation24_spill] sm:$0xff] }
 0x690   :  { %v1617_v59 = vmul.f32 0.2, %v1601_v31  ;;  %v1619_v51 = vmul.f32 0.2, %v1603_v24  ;;  %v1621_v56 = vmul.f32 0.2, %v1605_v58  ;;  %v1558_v57 = vmul.f32 %v1542_v32, %v3295_v6 }
 0x691   :  { %v1623_v16 = vmul.f32 0.2, %v1607_v2  ;;  %v1625_v38 = vmul.f32 0.2, %v1609_v46  ;;  %v1627_v18 = vmul.f32 0.2, %v1611_v47  ;;  %v1568_v40 = vrot.slane %v1560_v8, %v2791_v0 }
 0x692   :  { %v1629_v53 = vmul.f32 0.2, %v1613_v10  ;;  %v1631_v63 = vmul.f32 0.2, %v1615_v45  ;;  %1633 = vst [vmem:[#allocation10] sm:$0xff] %v1617_v59  ;;  %1635 = vst [vmem:[#allocation10 + $0x10] sm:$0xff] %v1619_v51 }
 0x693   :  { %1637 = vst [vmem:[#allocation10 + $0x20] sm:$0xff] %v1621_v56  ;;  %1639 = vst [vmem:[#allocation10 + $0x30] sm:$0xff] %v1623_v16  ;;  %v1570_v39 = vmul.f32 %v1568_v40, %v3296_v15  ;;  %v1572_v7 = vmul.f32 %v1568_v40, %v3297_v49  ;;  %v1574_v42 = vmul.f32 %v1568_v40, %v3298_v27  ;;  %v3302_v8 = vld [vmem:[#allocation30_spill] sm:$0xff]  ;;  %v3309_v55 = vld [vmem:[#allocation20_spill] sm:$0xff] }
 0x694   :  { %1641 = vst [vmem:[#allocation10 + $0x40] sm:$0xff] %v1625_v38  ;;  %1643 = vst [vmem:[#allocation10 + $0x50] sm:$0xff] %v1627_v18  ;;  %v1576_v52 = vmul.f32 %v1568_v40, %v3299_v33  ;;  %v1578_v0 = vmul.f32 %v1568_v40, %v3300_v21  ;;  %v1580_v32 = vmul.f32 %v1568_v40, %v3301_v48 }
 0x695   :  { %1645 = vst [vmem:[#allocation10 + $0x60] sm:$0xff] %v1629_v53  ;;  %1647 = vst [vmem:[#allocation10 + $0x70] sm:$0xff] %v1631_v63  ;;  %v1582_v28 = vmul.f32 %v1568_v40, %v3302_v8  ;;  %v1584_v54 = vmul.f32 %v1568_v40, %v3303_v34  ;;  %v1586_v60 = vadd.f32 %v1570_v39, %v1544_v4  ;;  %v3310_v4 = vld [vmem:[#allocation21_spill] sm:$0xff] }
 0x696   :  { %v1588_v43 = vadd.f32 %v1572_v7, %v1546_v44  ;;  %v1590_v29 = vadd.f32 %v1574_v42, %v1548_v17  ;;  %v1592_v61 = vadd.f32 %v1576_v52, %v1550_v36  ;;  %v1594_v41 = vadd.f32 %v1578_v0, %v1552_v26  ;;  %v3311_v17 = vld [vmem:[#allocation22_spill] sm:$0xff] }
 0x697   :  { %v1596_v13 = vadd.f32 %v1580_v32, %v1554_v19  ;;  %v1598_v20 = vadd.f32 %v1582_v28, %v1556_v14  ;;  %v1600_v1 = vadd.f32 %v1584_v54, %v1558_v57  ;;  %v1602_v23 = vadd.f32 %v1586_v60, %v3304_v9 }
 0x698   :  { %v1604_v37 = vadd.f32 %v1588_v43, %v3305_v11  ;;  %v1606_v62 = vadd.f32 %v1590_v29, %v3306_v50  ;;  %v1608_v35 = vadd.f32 %v1592_v61, %v3307_v22  ;;  %v1610_v3 = vadd.f32 %v1594_v41, %v3308_v30 }
 0x699   :  { %v1612_v25 = vadd.f32 %v1596_v13, %v3309_v55  ;;  %v1614_v44 = vadd.f32 %v1598_v20, %v3310_v4  ;;  %v1616_v36 = vadd.f32 %v1600_v1, %v3311_v17  ;;  %v1618_v26 = vmul.f32 0.2, %v1602_v23 }
 0x69a   :  { %v1620_v19 = vmul.f32 0.2, %v1604_v37  ;;  %v1622_v14 = vmul.f32 0.2, %v1606_v62  ;;  %v1624_v5 = vmul.f32 0.2, %v1608_v35 }
 0x69b   :  { %v1626_v12 = vmul.f32 0.2, %v1610_v3  ;;  %v1628_v31 = vmul.f32 0.2, %v1612_v25  ;;  %v1630_v24 = vmul.f32 0.2, %v1614_v44 }
 0x69c   :  { %v1632_v58 = vmul.f32 0.2, %v1616_v36  ;;  %1634 = vst [vmem:[#allocation10 + $0x8] sm:$0xff] %v1618_v26  ;;  %1636 = vst [vmem:[#allocation10 + $0x18] sm:$0xff] %v1620_v19 }
 0x69d   :  { %1638 = vst [vmem:[#allocation10 + $0x28] sm:$0xff] %v1622_v14  ;;  %1640 = vst [vmem:[#allocation10 + $0x38] sm:$0xff] %v1624_v5 }
 0x69e   :  { %1642 = vst [vmem:[#allocation10 + $0x48] sm:$0xff] %v1626_v12  ;;  %1644 = vst [vmem:[#allocation10 + $0x58] sm:$0xff] %v1628_v31 }
 0x69f   :  { %1646 = vst [vmem:[#allocation10 + $0x68] sm:$0xff] %v1630_v24  ;;  %1648 = vst [vmem:[#allocation10 + $0x78] sm:$0xff] %v1632_v58 }
 0x6a0   :  { %2004 = shalt.err (!%p2001_p3)
}
 0x6a1   :  { %s2005_s14 = scalar_lea.hbm %s3171_s13, 2048 }
 0x6a2   :  { %p2006_p4 = scmp.ne.s32.totalorder %s3171_s13, %s2005_s14  ;;  %p2009_p5 = scmp.lt.u32.totalorder %s2005_s14, %s3171_s13 }
 0x6a4   :  { %p2011_p6 = pnand %p2009_p5, %p2006_p4 }
 0x6a6   :  { %2014 = shalt.err (!%p2011_p6)
}
 0x6a7   :  { %s2033_s6 = smov 256   ;;  %s2034_s17 = smov 16  }
 0x6a8   :  { %1660 = dma.vmem_to_hbm [thread:$0]  %s1655_s28, 2048, %s3171_s13, [#allocation4], %s2033_s6, %s2033_s6, %s2034_s17  }
 0x6a9   :  { %2021 = dma.done.wait [#allocation4], 2048  }
 0x6aa   :  { %2022 = vsyncadd [#allocation4], 4294965248 }
 0x6ab   :  { %1664 = vsyncpa [#allocation3], 1 }
 0x6ac   :  { %1665 = vsyncpa [#allocation8], 1 }
 0x6ad   :  { %1666 = vsyncpa [#allocation4], 1 }
 0x6ae   :  { %1667 = vsyncpa [#allocation5], 1 }

</bundles_post_ra>
